<compile_context>
chip_gen: v6e
topology: v6e:2x2x1
jax: 0.10.0
libtpu: 0.0.40
codegen_flags: <defaults>
</compile_context>

<pallas_src>
import functools

import jax
import jax.numpy as jnp
from jax.experimental import pallas as pl
from jax.experimental.pallas import tpu as pltpu

# Constants matching the reference script.
D_INPUT = 3
N_FREQS = 10
LOG_SPACE = True


def _freq_bands(n_freqs: int, log_space: bool):
    """Same semantics as the torch.linspace construction in __init__."""
    if log_space:
        bands = 2.0 ** jnp.linspace(0.0, n_freqs - 1, n_freqs, dtype=jnp.float32)
    else:
        bands = jnp.linspace(2.0 ** 0.0, 2.0 ** (n_freqs - 1), n_freqs,
                             dtype=jnp.float32)
    # Baked in as Python floats (static, no params to load).
    return [float(b) for b in bands]


def _pos_enc_kernel(x_ref, o_ref, *, freqs, d_input):
    """x_ref: (d_input, T); o_ref: (d_input*(1+2*n_freqs), T).

    Rows = feature channels (PyTorch concat order), lanes = points.
    """
    x = x_ref[...]                                   # (d_input, T) float32
    nf = len(freqs)

    # Identity part.
    o_ref[0:d_input, :] = x

    # Dense scaled-coordinate slab: rows [i*d_input : (i+1)*d_input] = freqs[i]*x.
    # Sublane concat is cheap; gives two wide, vreg-dense EUP calls below.
    xf = jnp.concatenate([x * f for f in freqs], axis=0)   # (nf*d_input, T)
    s = jnp.sin(xf)
    c = jnp.cos(xf)

    # Scatter each 3-row sin/cos slab straight into its interleaved output slot
    # (no lane-axis concatenate, <=2 slabs meaningfully live at a time).
    for i in range(nf):
        src = slice(i * d_input, (i + 1) * d_input)
        sin_base = d_input * (1 + 2 * i)
        cos_base = sin_base + d_input
        o_ref[sin_base:sin_base + d_input, :] = s[src, :]
        o_ref[cos_base:cos_base + d_input, :] = c[src, :]


def positional_encoder(x: jax.Array,
                       n_freqs: int = N_FREQS,
                       log_space: bool = LOG_SPACE,
                       tile_n: int = 4096) -> jax.Array:
    """Apply NeRF positional encoding.  x: [N, d_input] float32 -> [N, d_output]."""
    n, d_input = x.shape
    d_output = d_input * (1 + 2 * n_freqs)
    freqs = _freq_bands(n_freqs, log_space)

    # Points go on the lane axis; tile must be a multiple of 128.  Clamp the
    # tile for small inputs so we never pad far beyond the real batch.
    tile_n = min(tile_n, pl.cdiv(n, 128) * 128)
    n_pad = pl.cdiv(n, tile_n) * tile_n

    xt = x.T                                          # (d_input, N) -- tiny array
    if n_pad != n:
        xt = jnp.pad(xt, ((0, 0), (0, n_pad - n)))

    kernel = functools.partial(_pos_enc_kernel, freqs=freqs, d_input=d_input)

    out_t = pl.pallas_call(
        kernel,
        out_shape=jax.ShapeDtypeStruct((d_output, n_pad), x.dtype),
        grid_spec=pltpu.PrefetchScalarGridSpec(
            num_scalar_prefetch=0,
            grid=(n_pad // tile_n,),
            in_specs=[pl.BlockSpec((d_input, tile_n), lambda i: (0, i))],
            out_specs=pl.BlockSpec((d_output, tile_n), lambda i: (0, i)),
        ),
        compiler_params=pltpu.CompilerParams(
            dimension_semantics=("parallel",)),   # grid steps shard across TCs on v7x
    )(xt)

    # Layout plumbing back to the reference (N, d_output) ordering.
    # TODO(synk): if the downstream consumer can take (d_output, N), return out_t
    # directly and skip this extra HBM pass over the (large) output.
    return out_t[:, :n].T


def _reference(x, n_freqs=N_FREQS, log_space=LOG_SPACE):
    freqs = _freq_bands(n_freqs, log_space)
    parts = [x]
    for f in freqs:
        parts.append(jnp.sin(x * f))
        parts.append(jnp.cos(x * f))
    return jnp.concatenate(parts, axis=-1)


if __name__ == "__main__":
    key = jax.random.PRNGKey(0)
    # Small point batch: 256 points with 3-D coordinates.
    x = jax.random.uniform(key, (256, D_INPUT), dtype=jnp.float32,
                           minval=-1.0, maxval=1.0)

    out = positional_encoder(x)
    out = jax.block_until_ready(out)

    assert out.shape == (256, D_INPUT * (1 + 2 * N_FREQS)), out.shape
    ref = _reference(x)
    assert jnp.allclose(out, ref, atol=1e-5, rtol=1e-5), \
        float(jnp.max(jnp.abs(out - ref)))

    print("KERNEL_OK")
</pallas_src>

<mosaic_0001>
module attributes {stable_mosaic.version = 11 : i64} {
  func.func @_pos_enc_kernel(%arg0: i32, %arg1: memref<3x256xf32, #tpu.memory_space<vmem>>, %arg2: memref<63x256xf32, #tpu.memory_space<vmem>>) attributes {dimension_semantics = [#tpu.dimension_semantics<parallel>], iteration_bounds = array<i64: 1>, scalar_prefetch = 0 : i64, scratch_operands = 0 : i64, tpu.core_type = #tpu.core_type<tc>, window_params = [{transform_indices = @transform_0, window_bounds = array<i64: 3, 256>}, {transform_indices = @transform_1, window_bounds = array<i64: 63, 256>}]} {
    %c0 = arith.constant 0 : index
    %c0_0 = arith.constant 0 : index
    %0 = vector.load %arg1[%c0, %c0_0] : memref<3x256xf32, #tpu.memory_space<vmem>>, vector<3x256xf32>
    %c0_1 = arith.constant 0 : index
    %c0_2 = arith.constant 0 : index
    %1 = vector.load %arg2[%c0_1, %c0_2] : memref<63x256xf32, #tpu.memory_space<vmem>>, vector<3x256xf32>
    tpu.vector_store %arg2[%c0_1, %c0_2], %0 {strides = array<i32>} : memref<63x256xf32, #tpu.memory_space<vmem>>, vector<3x256xf32>,
    %cst = arith.constant 1.000000e+00 : f32
    %2 = vector.broadcast %cst : f32 to vector<3x256xf32>
    %3 = arith.mulf %0, %2 : vector<3x256xf32>
    %cst_3 = arith.constant 2.000000e+00 : f32
    %4 = vector.broadcast %cst_3 : f32 to vector<3x256xf32>
    %5 = arith.mulf %0, %4 : vector<3x256xf32>
    %cst_4 = arith.constant 4.000000e+00 : f32
    %6 = vector.broadcast %cst_4 : f32 to vector<3x256xf32>
    %7 = arith.mulf %0, %6 : vector<3x256xf32>
    %cst_5 = arith.constant 8.000000e+00 : f32
    %8 = vector.broadcast %cst_5 : f32 to vector<3x256xf32>
    %9 = arith.mulf %0, %8 : vector<3x256xf32>
    %cst_6 = arith.constant 1.600000e+01 : f32
    %10 = vector.broadcast %cst_6 : f32 to vector<3x256xf32>
    %11 = arith.mulf %0, %10 : vector<3x256xf32>
    %cst_7 = arith.constant 3.200000e+01 : f32
    %12 = vector.broadcast %cst_7 : f32 to vector<3x256xf32>
    %13 = arith.mulf %0, %12 : vector<3x256xf32>
    %cst_8 = arith.constant 6.400000e+01 : f32
    %14 = vector.broadcast %cst_8 : f32 to vector<3x256xf32>
    %15 = arith.mulf %0, %14 : vector<3x256xf32>
    %cst_9 = arith.constant 1.280000e+02 : f32
    %16 = vector.broadcast %cst_9 : f32 to vector<3x256xf32>
    %17 = arith.mulf %0, %16 : vector<3x256xf32>
    %cst_10 = arith.constant 2.560000e+02 : f32
    %18 = vector.broadcast %cst_10 : f32 to vector<3x256xf32>
    %19 = arith.mulf %0, %18 : vector<3x256xf32>
    %cst_11 = arith.constant 5.120000e+02 : f32
    %20 = vector.broadcast %cst_11 : f32 to vector<3x256xf32>
    %21 = arith.mulf %0, %20 : vector<3x256xf32>
    %22 = tpu.concatenate %3, %5, %7, %9, %11, %13, %15, %17, %19, %21 in 0 : vector<3x256xf32>, vector<3x256xf32>, vector<3x256xf32>, vector<3x256xf32>, vector<3x256xf32>, vector<3x256xf32>, vector<3x256xf32>, vector<3x256xf32>, vector<3x256xf32>, vector<3x256xf32> -> vector<30x256xf32>
    %23 = math.sin %22 : vector<30x256xf32>
    %24 = math.cos %22 : vector<30x256xf32>
    %25 = vector.extract_strided_slice %23 {offsets = [0, 0], sizes = [3, 256], strides = [1, 1]} : vector<30x256xf32> to vector<3x256xf32>
    %c3 = arith.constant 3 : index
    %c0_12 = arith.constant 0 : index
    %26 = vector.load %arg2[%c3, %c0_12] : memref<63x256xf32, #tpu.memory_space<vmem>>, vector<3x256xf32>
    tpu.vector_store %arg2[%c3, %c0_12], %25 {strides = array<i32>} : memref<63x256xf32, #tpu.memory_space<vmem>>, vector<3x256xf32>,
    %27 = vector.extract_strided_slice %24 {offsets = [0, 0], sizes = [3, 256], strides = [1, 1]} : vector<30x256xf32> to vector<3x256xf32>
    %c6 = arith.constant 6 : index
    %c0_13 = arith.constant 0 : index
    %28 = vector.load %arg2[%c6, %c0_13] : memref<63x256xf32, #tpu.memory_space<vmem>>, vector<3x256xf32>
    tpu.vector_store %arg2[%c6, %c0_13], %27 {strides = array<i32>} : memref<63x256xf32, #tpu.memory_space<vmem>>, vector<3x256xf32>,
    %29 = vector.extract_strided_slice %23 {offsets = [3, 0], sizes = [3, 256], strides = [1, 1]} : vector<30x256xf32> to vector<3x256xf32>
    %c9 = arith.constant 9 : index
    %c0_14 = arith.constant 0 : index
    %30 = vector.load %arg2[%c9, %c0_14] : memref<63x256xf32, #tpu.memory_space<vmem>>, vector<3x256xf32>
    tpu.vector_store %arg2[%c9, %c0_14], %29 {strides = array<i32>} : memref<63x256xf32, #tpu.memory_space<vmem>>, vector<3x256xf32>,
    %31 = vector.extract_strided_slice %24 {offsets = [3, 0], sizes = [3, 256], strides = [1, 1]} : vector<30x256xf32> to vector<3x256xf32>
    %c12 = arith.constant 12 : index
    %c0_15 = arith.constant 0 : index
    %32 = vector.load %arg2[%c12, %c0_15] : memref<63x256xf32, #tpu.memory_space<vmem>>, vector<3x256xf32>
    tpu.vector_store %arg2[%c12, %c0_15], %31 {strides = array<i32>} : memref<63x256xf32, #tpu.memory_space<vmem>>, vector<3x256xf32>,
    %33 = vector.extract_strided_slice %23 {offsets = [6, 0], sizes = [3, 256], strides = [1, 1]} : vector<30x256xf32> to vector<3x256xf32>
    %c15 = arith.constant 15 : index
    %c0_16 = arith.constant 0 : index
    %34 = vector.load %arg2[%c15, %c0_16] : memref<63x256xf32, #tpu.memory_space<vmem>>, vector<3x256xf32>
    tpu.vector_store %arg2[%c15, %c0_16], %33 {strides = array<i32>} : memref<63x256xf32, #tpu.memory_space<vmem>>, vector<3x256xf32>,
    %35 = vector.extract_strided_slice %24 {offsets = [6, 0], sizes = [3, 256], strides = [1, 1]} : vector<30x256xf32> to vector<3x256xf32>
    %c18 = arith.constant 18 : index
    %c0_17 = arith.constant 0 : index
    %36 = vector.load %arg2[%c18, %c0_17] : memref<63x256xf32, #tpu.memory_space<vmem>>, vector<3x256xf32>
    tpu.vector_store %arg2[%c18, %c0_17], %35 {strides = array<i32>} : memref<63x256xf32, #tpu.memory_space<vmem>>, vector<3x256xf32>,
    %37 = vector.extract_strided_slice %23 {offsets = [9, 0], sizes = [3, 256], strides = [1, 1]} : vector<30x256xf32> to vector<3x256xf32>
    %c21 = arith.constant 21 : index
    %c0_18 = arith.constant 0 : index
    %38 = vector.load %arg2[%c21, %c0_18] : memref<63x256xf32, #tpu.memory_space<vmem>>, vector<3x256xf32>
    tpu.vector_store %arg2[%c21, %c0_18], %37 {strides = array<i32>} : memref<63x256xf32, #tpu.memory_space<vmem>>, vector<3x256xf32>,
    %39 = vector.extract_strided_slice %24 {offsets = [9, 0], sizes = [3, 256], strides = [1, 1]} : vector<30x256xf32> to vector<3x256xf32>
    %c24 = arith.constant 24 : index
    %c0_19 = arith.constant 0 : index
    %40 = vector.load %arg2[%c24, %c0_19] : memref<63x256xf32, #tpu.memory_space<vmem>>, vector<3x256xf32>
    tpu.vector_store %arg2[%c24, %c0_19], %39 {strides = array<i32>} : memref<63x256xf32, #tpu.memory_space<vmem>>, vector<3x256xf32>,
    %41 = vector.extract_strided_slice %23 {offsets = [12, 0], sizes = [3, 256], strides = [1, 1]} : vector<30x256xf32> to vector<3x256xf32>
    %c27 = arith.constant 27 : index
    %c0_20 = arith.constant 0 : index
    %42 = vector.load %arg2[%c27, %c0_20] : memref<63x256xf32, #tpu.memory_space<vmem>>, vector<3x256xf32>
    tpu.vector_store %arg2[%c27, %c0_20], %41 {strides = array<i32>} : memref<63x256xf32, #tpu.memory_space<vmem>>, vector<3x256xf32>,
    %43 = vector.extract_strided_slice %24 {offsets = [12, 0], sizes = [3, 256], strides = [1, 1]} : vector<30x256xf32> to vector<3x256xf32>
    %c30 = arith.constant 30 : index
    %c0_21 = arith.constant 0 : index
    %44 = vector.load %arg2[%c30, %c0_21] : memref<63x256xf32, #tpu.memory_space<vmem>>, vector<3x256xf32>
    tpu.vector_store %arg2[%c30, %c0_21], %43 {strides = array<i32>} : memref<63x256xf32, #tpu.memory_space<vmem>>, vector<3x256xf32>,
    %45 = vector.extract_strided_slice %23 {offsets = [15, 0], sizes = [3, 256], strides = [1, 1]} : vector<30x256xf32> to vector<3x256xf32>
    %c33 = arith.constant 33 : index
    %c0_22 = arith.constant 0 : index
    %46 = vector.load %arg2[%c33, %c0_22] : memref<63x256xf32, #tpu.memory_space<vmem>>, vector<3x256xf32>
    tpu.vector_store %arg2[%c33, %c0_22], %45 {strides = array<i32>} : memref<63x256xf32, #tpu.memory_space<vmem>>, vector<3x256xf32>,
    %47 = vector.extract_strided_slice %24 {offsets = [15, 0], sizes = [3, 256], strides = [1, 1]} : vector<30x256xf32> to vector<3x256xf32>
    %c36 = arith.constant 36 : index
    %c0_23 = arith.constant 0 : index
    %48 = vector.load %arg2[%c36, %c0_23] : memref<63x256xf32, #tpu.memory_space<vmem>>, vector<3x256xf32>
    tpu.vector_store %arg2[%c36, %c0_23], %47 {strides = array<i32>} : memref<63x256xf32, #tpu.memory_space<vmem>>, vector<3x256xf32>,
    %49 = vector.extract_strided_slice %23 {offsets = [18, 0], sizes = [3, 256], strides = [1, 1]} : vector<30x256xf32> to vector<3x256xf32>
    %c39 = arith.constant 39 : index
    %c0_24 = arith.constant 0 : index
    %50 = vector.load %arg2[%c39, %c0_24] : memref<63x256xf32, #tpu.memory_space<vmem>>, vector<3x256xf32>
    tpu.vector_store %arg2[%c39, %c0_24], %49 {strides = array<i32>} : memref<63x256xf32, #tpu.memory_space<vmem>>, vector<3x256xf32>,
    %51 = vector.extract_strided_slice %24 {offsets = [18, 0], sizes = [3, 256], strides = [1, 1]} : vector<30x256xf32> to vector<3x256xf32>
    %c42 = arith.constant 42 : index
    %c0_25 = arith.constant 0 : index
    %52 = vector.load %arg2[%c42, %c0_25] : memref<63x256xf32, #tpu.memory_space<vmem>>, vector<3x256xf32>
    tpu.vector_store %arg2[%c42, %c0_25], %51 {strides = array<i32>} : memref<63x256xf32, #tpu.memory_space<vmem>>, vector<3x256xf32>,
    %53 = vector.extract_strided_slice %23 {offsets = [21, 0], sizes = [3, 256], strides = [1, 1]} : vector<30x256xf32> to vector<3x256xf32>
    %c45 = arith.constant 45 : index
    %c0_26 = arith.constant 0 : index
    %54 = vector.load %arg2[%c45, %c0_26] : memref<63x256xf32, #tpu.memory_space<vmem>>, vector<3x256xf32>
    tpu.vector_store %arg2[%c45, %c0_26], %53 {strides = array<i32>} : memref<63x256xf32, #tpu.memory_space<vmem>>, vector<3x256xf32>,
    %55 = vector.extract_strided_slice %24 {offsets = [21, 0], sizes = [3, 256], strides = [1, 1]} : vector<30x256xf32> to vector<3x256xf32>
    %c48 = arith.constant 48 : index
    %c0_27 = arith.constant 0 : index
    %56 = vector.load %arg2[%c48, %c0_27] : memref<63x256xf32, #tpu.memory_space<vmem>>, vector<3x256xf32>
    tpu.vector_store %arg2[%c48, %c0_27], %55 {strides = array<i32>} : memref<63x256xf32, #tpu.memory_space<vmem>>, vector<3x256xf32>,
    %57 = vector.extract_strided_slice %23 {offsets = [24, 0], sizes = [3, 256], strides = [1, 1]} : vector<30x256xf32> to vector<3x256xf32>
    %c51 = arith.constant 51 : index
    %c0_28 = arith.constant 0 : index
    %58 = vector.load %arg2[%c51, %c0_28] : memref<63x256xf32, #tpu.memory_space<vmem>>, vector<3x256xf32>
    tpu.vector_store %arg2[%c51, %c0_28], %57 {strides = array<i32>} : memref<63x256xf32, #tpu.memory_space<vmem>>, vector<3x256xf32>,
    %59 = vector.extract_strided_slice %24 {offsets = [24, 0], sizes = [3, 256], strides = [1, 1]} : vector<30x256xf32> to vector<3x256xf32>
    %c54 = arith.constant 54 : index
    %c0_29 = arith.constant 0 : index
    %60 = vector.load %arg2[%c54, %c0_29] : memref<63x256xf32, #tpu.memory_space<vmem>>, vector<3x256xf32>
    tpu.vector_store %arg2[%c54, %c0_29], %59 {strides = array<i32>} : memref<63x256xf32, #tpu.memory_space<vmem>>, vector<3x256xf32>,
    %61 = vector.extract_strided_slice %23 {offsets = [27, 0], sizes = [3, 256], strides = [1, 1]} : vector<30x256xf32> to vector<3x256xf32>
    %c57 = arith.constant 57 : index
    %c0_30 = arith.constant 0 : index
    %62 = vector.load %arg2[%c57, %c0_30] : memref<63x256xf32, #tpu.memory_space<vmem>>, vector<3x256xf32>
    tpu.vector_store %arg2[%c57, %c0_30], %61 {strides = array<i32>} : memref<63x256xf32, #tpu.memory_space<vmem>>, vector<3x256xf32>,
    %63 = vector.extract_strided_slice %24 {offsets = [27, 0], sizes = [3, 256], strides = [1, 1]} : vector<30x256xf32> to vector<3x256xf32>
    %c60 = arith.constant 60 : index
    %c0_31 = arith.constant 0 : index
    %64 = vector.load %arg2[%c60, %c0_31] : memref<63x256xf32, #tpu.memory_space<vmem>>, vector<3x256xf32>
    tpu.vector_store %arg2[%c60, %c0_31], %63 {strides = array<i32>} : memref<63x256xf32, #tpu.memory_space<vmem>>, vector<3x256xf32>,
    return
  }
  func.func @transform_0(%arg0: i32) -> (i32, i32) {
    %c0_i32 = arith.constant 0 : i32
    %c0_i32_0 = arith.constant 0 : i32
    return %c0_i32, %arg0 : i32, i32
  }
  func.func @transform_1(%arg0: i32) -> (i32, i32) {
    %c0_i32 = arith.constant 0 : i32
    %c0_i32_0 = arith.constant 0 : i32
    return %c0_i32, %arg0 : i32, i32
  }
}

</mosaic_0001>

<bundles_post_ra>
// kernel: tpu_custom_call.1
= control target key start
LH: loop header
LB: loop body
LE: loop exit
PB: predicated region body
PF: predicated region fallthrough
CT: control target
= control target key end

     0   :  { %6 = vsyncpa [#allocation3], 0  ;;  %s3062_s0 = inlined_call_operand.hbm [shape: f32[3,256], index: 0, kind: input, shape index: {}]   ;;  %s3063_s1 = inlined_call_operand.hbm [shape: f32[63,256], index: 1, kind: output, shape index: {}]  }
   0x1   :  { %7 = vsyncpa [#allocation4], 0  ;;  %s2119_s6 = smov [#allocation2]  }
   0x2   :  { %s14_s7 = sshll.u32 %s2119_s6, 4  ;;  %s15_s7 = int_to_ptr.vmem [resolvable:$true] %s14_s7 }
   0x3   :  { %s2083_s8 = scalar_lea.vmem %s15_s7, 128  ;;  %p2088_p1 = scmp.lt.s32.totalorder %s15_s7, %s15_s7 }
   0x4   :  { %p2084_p0 = scmp.ne.s32.totalorder %s15_s7, %s2083_s8  ;;  %p2089_p2 = scmp.lt.s32.totalorder %s2083_s8, %s2083_s8 }
   0x6   :  { %p2090_p3 = por %p2089_p2, %p2088_p1 }
   0x8   :  { %p2091_p4 = pnand %p2090_p3, %p2084_p0 }
   0xa   :  { %2094 = shalt.err (!%p2091_p4)
}
   0xb   :  { %17 = dma.hbm_to_vmem [thread:$0]  %s3062_s0, 128, %s15_s7, [#allocation3]  }
   0xc   :  { %2115 = dma.done.wait [#allocation3], 128  }
   0xd   :  { %2116 = vsyncadd [#allocation3], 4294967168  ;;  %v2142_v0 = vld [vmem:[#allocation2] sm:$0x77]  ;;  %vm3064_vm0 = vcmask 1042432   ;;  %vm87_vm1 = vcmask 1045504  }
   0xe   :  { %25 = vst [vmem:[#allocation5] sm:$0x7] %v2142_v0  ;;  %v23_v1 = vcombine.high %v2142_v0, %v2142_v0  ;;  %v27_v2 = vmul.f32 2.0, %v2142_v0  ;;  %v28_v3 = vmul.f32 4.0, %v2142_v0  ;;  %v29_v4 = vmul.f32 8.0, %v2142_v0  ;;  %s2126_s0 = smov [#allocation5]  }
   0xf   :  { %v2151_v5 = vmul.f32 16.0, %v2142_v0  ;;  %vm3066_vm2 = vcmask 1040384   ;;  %v2158_v14 = vmul.f32 32.0, %v2142_v0  ;;  %vm3065_vm3 = vcmask 1043456   ;;  %s1924_s11 = sshll.u32 %s2126_s0, 4  ;;  %s1925_s11 = int_to_ptr.vmem [resolvable:$true] %s1924_s11 }
  0x10   :  { %26 = vst [vmem:[#allocation5 + $0x8] sm:$0x7] %v23_v1  ;;  %v37_v6 = vcombine.high %v27_v2, %v27_v2  ;;  %v38_v7 = vrot.slane %v27_v2, 5  ;;  %v43_v8 = vcombine.high %v28_v3, %v28_v3  ;;  %v44_v9 = vrot.slane %v28_v3, 2  ;;  %s2095_s12 = scalar_lea.vmem %s1925_s11, 2048  ;;  %p2100_p6 = scmp.lt.s32.totalorder %s1925_s11, %s1925_s11 }
  0x11   :  { %v50_v10 = vrot.slane %v29_v4, 7  ;;  %v55_v11 = vcombine.low %v2151_v5, %v2151_v5  ;;  %v59_v21 = vrot.slane %v2158_v14, 1  ;;  %vm96_vm4 = vcmask 1046528   ;;  %p2096_p5 = scmp.ne.s32.totalorder %s1925_s11, %s2095_s12  ;;  %p2101_p7 = scmp.lt.s32.totalorder %s2095_s12, %s2095_s12 }
  0x12   :  { %v39_v12 = vrot.slane %v37_v6, 5  ;;  %v85_v13 = vsel %vm3064_vm0, %v2142_v0, %v38_v7  ;;  %v45_v15 = vrot.slane %v43_v8, 2  ;;  %v49_v28 = vcombine.high %v29_v4, %v29_v4 }
  0x13   :  { %v2161_v16 = vsel %vm87_vm1, %v85_v13, %v44_v9  ;;  %v91_v17 = vsel %vm3066_vm2, %v44_v9, %v50_v10  ;;  %v58_v42 = vcombine.high %v2158_v14, %v2158_v14  ;;  %v2120_v53 = vmov 683565275   ;;  %p2102_p8 = por %p2101_p7, %p2100_p6 }
  0x14   :  { %v86_v18 = vsel %vm3064_vm0, %v23_v1, %v39_v12  ;;  %v107_v19 = vand.u32 2147483647, %v2161_v16  ;;  %v110_v20 = vand.u32 2139095040, %v2161_v16  ;;  %v94_v23 = vsel %vm3065_vm3, %v91_v17, %v55_v11 }
  0x15   :  { %v2169_v22 = vsel %vm87_vm1, %v86_v18, %v45_v15  ;;  %v2181_v31 = vsel %vm96_vm4, %v94_v23, %v59_v21  ;;  %v51_v37 = vrot.slane %v49_v28, 7  ;;  %v2121_v55 = vmov 2475754826   ;;  %p2103_p9 = pnand %p2102_p8, %p2096_p5 }
  0x16   :  { %v211_v24 = vand.u32 2147483647, %v2169_v22  ;;  %v214_v25 = vand.u32 2139095040, %v2169_v22  ;;  %v111_v26 = vshrl.u32 %v110_v20, 23  ;;  %v114_v27 = vand.u32 8388607, %v107_v19 }
  0x17   :  { %v318_v34 = vand.u32 2139095040, %v2181_v31  ;;  %v2189_v47 = vsel %vm3066_vm2, %v45_v15, %v51_v37  ;;  %v2122_v61 = vmov 2131351028   ;;  %v2123_v63 = vmov 2102212464  }
  0x18   :  { %v215_v29 = vshrl.u32 %v214_v25, 23  ;;  %v218_v30 = vand.u32 8388607, %v211_v24  ;;  %v1936_v32 = vadd.s32 4294967169, %v111_v26  ;;  %v115_v35 = vor.u32 8388608, %v114_v27 }
  0x19   :  { %v319_v40 = vshrl.u32 %v318_v34, 23  ;;  %v2124_v2 = vmov 920167782   ;;  %v2125_v11 = vmov 1326507024  }
  0x1a   :  { %v1940_v33 = vadd.s32 4294967169, %v215_v29  ;;  %v117_v36 = vadd.s32 1, %v1936_v32  ;;  %v219_v38 = vor.u32 8388608, %v218_v30  ;;  %v2186_v46 = vshll.u32 %v115_v35, 8 }
  0x1b   :  { %v1944_v43 = vadd.s32 4294967169, %v319_v40 }
  0x1c   :  { %v221_v39 = vadd.s32 1, %v1940_v33  ;;  %vm118_vm5 = vcmp.gt.s32.totalorder %v117_v36, 0  ;;  %v2191_v50 = vshll.u32 %v219_v38, 8 }
  0x1d   :  { %v119_v41 = vsel %vm118_vm5, %v117_v36, 0  ;;  %v2197_v57 = vadd.s32 1, %v1944_v43 }
  0x1e   :  { %vm222_vm6 = vcmp.gt.s32.totalorder %v221_v39, 0  ;;  %v121_v45 = vand.u32 31, %v119_v41  ;;  %v2193_v51 = vshrl.u32 %v119_v41, 5 }
  0x1f   :  { %v223_v44 = vsel %vm222_vm6, %v221_v39, 0  ;;  %vm326_vm1 = vcmp.gt.s32.totalorder %v2197_v57, 0  ;;  %vm109_vm6 = vcmp.lt.s32.totalorder %v2161_v16, 0 }
  0x20   :  { %v224_v48 = vshrl.u32 %v223_v44, 5  ;;  %v225_v49 = vand.u32 31, %v223_v44  ;;  %v122_v52 = vsub.s32 32, %v121_v45  ;;  %v124_v54 = vshll.u32 %v2120_v53, %v121_v45 }
  0x21   :  { %v127_v56 = vshll.u32 %v2121_v55, %v121_v45  ;;  %v130_v4 = vshll.u32 %v2122_v61, %v121_v45  ;;  %vm139_vm11 = vcmp.lt.s32.totalorder %v2193_v51, 1  ;;  %vm140_vm12 = vcmp.lt.s32.totalorder %v2193_v51, 2 }
  0x22   :  { %v226_v58 = vsub.s32 32, %v225_v49  ;;  %v228_v59 = vshll.u32 %v2120_v53, %v225_v49  ;;  %v231_v60 = vshll.u32 %v2121_v55, %v225_v49  ;;  %v234_v62 = vshll.u32 %v2122_v61, %v225_v49 }
  0x23   :  { %v237_v1 = vshll.u32 %v2123_v63, %v225_v49  ;;  %v240_v3 = vshll.u32 %v2124_v2, %v225_v49  ;;  %vm243_vm7 = vcmp.lt.s32.totalorder %v224_v48, 1  ;;  %vm244_vm8 = vcmp.lt.s32.totalorder %v224_v48, 2 }
  0x24   :  { %v227_v6 = vshrl.u32 %v2120_v53, %v226_v58  ;;  %v229_v7 = vshrl.u32 %v2121_v55, %v226_v58  ;;  %v232_v8 = vshrl.u32 %v2122_v61, %v226_v58  ;;  %v235_v9 = vshrl.u32 %v2123_v63, %v226_v58 }
  0x25   :  { %v238_v10 = vshrl.u32 %v2124_v2, %v226_v58  ;;  %v241_v12 = vshrl.u32 %v2125_v11, %v226_v58  ;;  %vm245_vm9 = vcmp.lt.s32.totalorder %v224_v48, 3  ;;  %vm246_vm10 = vcmp.lt.s32.totalorder %v224_v48, 4 }
  0x26   :  { %v230_v13 = vor.u32 %v229_v7, %v228_v59  ;;  %v233_v15 = vor.u32 %v232_v8, %v231_v60  ;;  %v236_v17 = vor.u32 %v235_v9, %v234_v62  ;;  %v125_v23 = vshrl.u32 %v2121_v55, %v122_v52 }
  0x27   :  { %v239_v18 = vor.u32 %v238_v10, %v237_v1  ;;  %v242_v20 = vor.u32 %v241_v12, %v240_v3  ;;  %v128_v25 = vshrl.u32 %v2122_v61, %v122_v52  ;;  %v123_v34 = vshrl.u32 %v2120_v53, %v122_v52 }
  0x28   :  { %v247_v26 = vsel %vm243_vm7, %v227_v6, %v230_v13  ;;  %v248_v27 = vsel %vm246_vm10, %v236_v17, 2102212464  ;;  %v251_v28 = vsel %vm243_vm7, %v230_v13, %v233_v15  ;;  %v255_v29 = vsel %vm243_vm7, %v233_v15, %v236_v17 }
  0x29   :  { %v249_v30 = vsel %vm245_vm9, %v233_v15, %v248_v27  ;;  %v252_v32 = vsel %vm246_vm10, %v239_v18, 920167782  ;;  %v256_v33 = vsel %vm246_vm10, %v242_v20, 1326507024  ;;  %v126_v38 = vor.u32 %v125_v23, %v124_v54 }
  0x2a   :  { %v250_v35 = vsel %vm244_vm8, %v247_v26, %v249_v30  ;;  %v253_v36 = vsel %vm245_vm9, %v236_v17, %v252_v32  ;;  %v257_v37 = vsel %vm245_vm9, %v239_v18, %v256_v33  ;;  %v129_v41 = vor.u32 %v128_v25, %v127_v56 }
  0x2b   :  { %v254_v39 = vsel %vm244_vm8, %v251_v28, %v253_v36  ;;  %v258_v40 = vsel %vm244_vm8, %v255_v29, %v257_v37  ;;  %v131_v43 = vshrl.u32 %v2123_v63, %v122_v52  ;;  %v133_v62 = vshll.u32 %v2123_v63, %v121_v45 }
  0x2c   :  { %v2225_v44 = vmul.u32.u64.low %v2191_v50, %v258_v40  ;;  %v2226_v49 = vmul.u32.u64.high %v2191_v50, %v258_v40, %v2225_v44  ;;  %v2229_v58 = vmul.u32.u64.low %v2191_v50, %v254_v39  ;;  %v2230_v59 = vmul.u32.u64.high %v2191_v50, %v254_v39, %v2229_v58 }
  0x2d   :  { %v132_v60 = vor.u32 %v131_v43, %v130_v4  ;;  %v134_v54 = vshrl.u32 %v2124_v2, %v122_v52  ;;  %v136_v48 = vshll.u32 %v2124_v2, %v121_v45  ;;  %v266_v56 = vmul.u32 %v2191_v50, %v250_v35 }
  0x2e   :  { %v137_v1 = vshrl.u32 %v2125_v11, %v122_v52  ;;  %vm141_vm13 = vcmp.lt.s32.totalorder %v2193_v51, 3  ;;  %vm142_vm14 = vcmp.lt.s32.totalorder %v2193_v51, 4  ;;  %v143_v4 = vsel %vm139_vm11, %v123_v34, %v126_v38 }
  0x2f   :  { %v135_v3 = vor.u32 %v134_v54, %v133_v62  ;;  %vm268_vm15 = vc.u32 %v2226_v49, %v2229_v58  ;;  %v269_v6 = vadd.s32 1, %v2230_v59  ;;  %v147_v7 = vsel %vm139_vm11, %v126_v38, %v129_v41 }
  0x30   :  { %v138_v45 = vor.u32 %v137_v1, %v136_v48  ;;  %v144_v50 = vsel %vm142_vm14, %v132_v60, 2102212464  ;;  %v151_v52 = vsel %vm139_vm11, %v129_v41, %v132_v60  ;;  %v315_v20 = vand.u32 2147483647, %v2181_v31 }
  0x31   :  { %v148_v8 = vsel %vm142_vm14, %v135_v3, 920167782  ;;  %v270_v9 = vsel %vm268_vm15, %v269_v6, %v2230_v59  ;;  %v145_v10 = vsel %vm141_vm13, %v129_v41, %v144_v50  ;;  %v327_v32 = vsel %vm326_vm1, %v2197_v57, 0 }
  0x32   :  { %v149_v12 = vsel %vm141_vm13, %v132_v60, %v148_v8  ;;  %v152_v13 = vsel %vm142_vm14, %v138_v45, 1326507024  ;;  %v271_v15 = vadd.s32 %v270_v9, %v266_v56  ;;  %v146_v23 = vsel %vm140_vm12, %v143_v4, %v145_v10 }
  0x33   :  { %v150_v17 = vsel %vm140_vm12, %v147_v7, %v149_v12  ;;  %v153_v18 = vsel %vm141_vm13, %v135_v3, %v152_v13  ;;  %v162_v34 = vmul.u32 %v2186_v46, %v146_v23  ;;  %v2276_v51 = vrot.slane %v58_v42, 1 }
  0x34   :  { %v154_v25 = vsel %vm140_vm12, %v151_v52, %v153_v18  ;;  %v2261_v26 = vmul.u32.u64.low %v2186_v46, %v150_v17  ;;  %v2262_v27 = vmul.u32.u64.high %v2186_v46, %v150_v17, %v2261_v26  ;;  %v272_v28 = vadd.s32 536870912, %v271_v15 }
  0x35   :  { %v2266_v29 = vmul.u32.u64.low %v2186_v46, %v154_v25  ;;  %v2267_v30 = vmul.u32.u64.high %v2186_v46, %v154_v25, %v2266_v29  ;;  %v329_v35 = vand.u32 31, %v327_v32  ;;  %v95_v37 = vsel %vm3065_vm3, %v2189_v47, %v2151_v5 }
  0x36   :  { %v2270_v33 = vshrl.u32 %v272_v28, 30  ;;  %v165_v36 = vadd.s32 1, %v2262_v27  ;;  %v322_v46 = vand.u32 8388607, %v315_v20  ;;  %v2292_v40 = vsel %vm96_vm4, %v95_v37, %v2276_v51 }
  0x37   :  { %vm164_vm5 = vc.u32 %v2267_v30, %v2261_v26  ;;  %v330_v41 = vsub.s32 32, %v329_v35  ;;  %v2296_v44 = vmul.f32 64.0, %v2142_v0  ;;  %v332_v59 = vshll.u32 %v2120_v53, %v329_v35 }
  0x38   :  { %v274_v38 = vshll.u32 %v2270_v33, 30  ;;  %v166_v57 = vsel %vm164_vm5, %v165_v36, %v2262_v27  ;;  %v323_v43 = vor.u32 8388608, %v322_v46  ;;  %v335_v60 = vshll.u32 %v2121_v55, %v329_v35 }
  0x39   :  { %v167_v42 = vadd.s32 %v166_v57, %v162_v34  ;;  %v419_v62 = vand.u32 2147483647, %v2292_v40  ;;  %v422_v54 = vand.u32 2139095040, %v2292_v40  ;;  %v333_v1 = vshrl.u32 %v2121_v55, %v330_v41 }
  0x3a   :  { %v2288_v39 = vsub.s32 %v271_v15, %v274_v38  ;;  %v336_v3 = vshrl.u32 %v2122_v61, %v330_v41  ;;  %v338_v4 = vshll.u32 %v2122_v61, %v329_v35  ;;  %v339_v6 = vshrl.u32 %v2123_v63, %v330_v41 }
  0x3b   :  { %v168_v47 = vadd.s32 536870912, %v167_v42  ;;  %v341_v45 = vshll.u32 %v2123_v63, %v329_v35  ;;  %v342_v7 = vshrl.u32 %v2124_v2, %v330_v41  ;;  %vm213_vm4 = vcmp.lt.s32.totalorder %v2169_v22, 0 }
  0x3c   :  { %v277_v5 = vsub.s32 0, %v2288_v39  ;;  %v328_v52 = vshrl.u32 %v327_v32, 5  ;;  %v2311_v9 = vshll.u32 %v323_v43, 8  ;;  %v267_v10 = vadd.s32 %v2229_v58, %v2226_v49 }
  0x3d   :  { %v169_v56 = vshrl.u32 %v168_v47, 30  ;;  %v297_v12 = vsub.s32 4, %v2270_v33  ;;  %v344_v13 = vshll.u32 %v2124_v2, %v329_v35  ;;  %v345_v15 = vshrl.u32 %v2125_v11, %v330_v41 }
  0x3e   :  { %v1941_v48 = vmin.u32 %v277_v5, %v2288_v39  ;;  %v331_v23 = vshrl.u32 %v2120_v53, %v330_v41  ;;  %v334_v25 = vor.u32 %v333_v1, %v332_v59  ;;  %v337_v28 = vor.u32 %v336_v3, %v335_v60 }
  0x3f   :  { %v170_v8 = vshll.u32 %v169_v56, 30  ;;  %v193_v27 = vsub.s32 4, %v169_v56  ;;  %v340_v29 = vor.u32 %v339_v6, %v338_v4  ;;  %v343_v32 = vor.u32 %v342_v7, %v341_v45 }
  0x40   :  { %v279_v50 = vclz %v1941_v48  ;;  %vm347_vm8 = vcmp.lt.s32.totalorder %v328_v52, 1  ;;  %vm350_vm9 = vcmp.lt.s32.totalorder %v328_v52, 4  ;;  %v346_v58 = vor.u32 %v345_v15, %v344_v13 }
  0x41   :  { %v2318_v18 = vsub.s32 %v167_v42, %v170_v8  ;;  %vm348_vm10 = vcmp.lt.s32.totalorder %v328_v52, 2  ;;  %v352_v35 = vsel %vm350_vm9, %v340_v29, 2102212464  ;;  %vm2327_vm11 = vcmp.le.f32.partialorder %v211_v24, 0.7853982 }
  0x42   :  { %v1942_v17 = vadd.s32 4294967294, %v279_v50  ;;  %vm2333_vm12 = vcmp.le.f32.partialorder %v107_v19, 0.7853982  ;;  %vm349_vm13 = vcmp.lt.s32.totalorder %v328_v52, 3  ;;  %v351_v41 = vsel %vm347_vm8, %v331_v23, %v334_v25 }
  0x43   :  { %v173_v34 = vsub.s32 0, %v2318_v18  ;;  %v356_v5 = vsel %vm350_vm9, %v343_v32, 920167782  ;;  %v353_v24 = vsel %vm349_vm13, %v337_v28, %v352_v35  ;;  %v163_v60 = vadd.s32 %v2261_v26, %v2267_v30 }
  0x44   :  { %vm1943_vm7 = vcmp.lt.s32.totalorder %v1942_v17, 0  ;;  %v194_v19 = vsel %vm109_vm6, %v193_v27, %v169_v56  ;;  %v298_v48 = vsel %vm213_vm4, %v297_v12, %v2270_v33  ;;  %v423_v1 = vshrl.u32 %v422_v54, 23 }
  0x45   :  { %v282_v49 = vsel %vm1943_vm7, 0, %v1942_v17  ;;  %v1937_v46 = vmin.u32 %v173_v34, %v2318_v18  ;;  %v357_v45 = vsel %vm349_vm13, %v340_v29, %v356_v5  ;;  %v354_v7 = vsel %vm348_vm10, %v351_v41, %v353_v24 }
  0x46   :  { %v283_v36 = vsub.s32 32, %v282_v49  ;;  %v284_v37 = vshll.u32 %v2288_v39, %v282_v49  ;;  %v287_v38 = vsub.s32 4294967266, %v282_v49  ;;  %v355_v39 = vsel %vm347_vm8, %v334_v25, %v337_v28 }
  0x47   :  { %v175_v59 = vclz %v1937_v46  ;;  %v358_v50 = vsel %vm348_vm10, %v355_v39, %v357_v45  ;;  %v359_v8 = vsel %vm347_vm8, %v337_v28, %v340_v29  ;;  %v360_v26 = vsel %vm350_vm9, %v346_v58, 1326507024 }
  0x48   :  { %v285_v47 = vshrl.u32 %v267_v10, %v283_v36  ;;  %v288_v43 = vadd.s32 127, %v287_v38  ;;  %v361_v10 = vsel %vm349_vm13, %v343_v32, %v360_v26  ;;  %v300_v27 = vsel %vm2327_vm11, 0, %v298_v48 }
  0x49   :  { %v1938_v6 = vadd.s32 4294967294, %v175_v59  ;;  %v362_v54 = vsel %vm348_vm10, %v359_v8, %v361_v10  ;;  %v2356_v12 = vmul.u32.u64.low %v2311_v9, %v358_v50  ;;  %v2357_v13 = vmul.u32.u64.high %v2311_v9, %v358_v50, %v2356_v12 }
  0x4a   :  { %v286_v3 = vor.u32 %v285_v47, %v284_v37  ;;  %v289_v4 = vshll.u32 %v288_v43, 23  ;;  %v2364_v28 = vmul.u32.u64.low %v2311_v9, %v362_v54  ;;  %v2365_v29 = vmul.u32.u64.high %v2311_v9, %v362_v54, %v2364_v28 }
  0x4b   :  { %vm1939_vm14 = vcmp.lt.s32.totalorder %v1938_v6, 0  ;;  %v1948_v32 = vadd.s32 4294967169, %v423_v1  ;;  %v196_v58 = vsel %vm2333_vm12, 0, %v194_v19  ;;  %v370_v35 = vmul.u32 %v2311_v9, %v354_v7 }
  0x4c   :  { %v290_v30 = vor.u32 4788187, %v289_v4  ;;  %v293_v56 = vcvt.s32.f32 %v286_v3  ;;  %v178_v33 = vsel %vm1939_vm14, 0, %v1938_v6  ;;  %v373_v36 = vadd.s32 1, %v2357_v13 }
  0x4d   :  { %v179_v17 = vsub.s32 32, %v178_v33  ;;  %v180_v23 = vshll.u32 %v2318_v18, %v178_v33  ;;  %v183_v25 = vsub.s32 4294967266, %v178_v33  ;;  %v429_v18 = vadd.s32 1, %v1948_v32 }
  0x4e   :  { %v291_v15 = vand.u32 2147483647, %v290_v30  ;;  %v2372_v37 = vmul.f32 128.0, %v2142_v0  ;;  %v426_v39 = vand.u32 8388607, %v419_v62  ;;  %v200_v5 = vadd.s32 3, %v196_v58 }
  0x4f   :  { %v181_v34 = vshrl.u32 %v163_v60, %v179_v17  ;;  %v184_v49 = vadd.s32 127, %v183_v25  ;;  %v304_v47 = vadd.s32 3, %v300_v27  ;;  %vm372_vm15 = vc.u32 %v2365_v29, %v2356_v12 }
  0x50   :  { %v294_v52 = vmul.f32 %v293_v56, %v291_v15  ;;  %vm430_vm1 = vcmp.gt.s32.totalorder %v429_v18, 0  ;;  %v374_v24 = vsel %vm372_vm15, %v373_v36, %v2357_v13  ;;  %v64_v1 = vcombine.high %v2296_v44, %v2296_v44 }
  0x51   :  { %v182_v46 = vor.u32 %v181_v34, %v180_v23  ;;  %v185_v41 = vshll.u32 %v184_v49, 23  ;;  %v375_v19 = vadd.s32 %v374_v24, %v370_v35  ;;  %v431_v48 = vsel %vm430_vm1, %v429_v18, 0 }
  0x52   :  { %v295_v38 = vxor.u32 2147483648, %v294_v52  ;;  %v433_v4 = vand.u32 31, %v431_v48  ;;  %v65_v6 = vrot.slane %v2296_v44, 6  ;;  %v2387_v45 = vand.u32 3, %v304_v47 }
  0x53   :  { %v186_v43 = vor.u32 4788187, %v185_v41  ;;  %v189_v59 = vcvt.s32.f32 %v182_v46  ;;  %v2389_v7 = vand.u32 3, %v300_v27  ;;  %v376_v50 = vadd.s32 536870912, %v375_v19 }
  0x54   :  { %v296_v9 = vsel %vm213_vm4, %v295_v38, %v294_v52  ;;  %v2391_v26 = vand.u32 3, %v200_v5  ;;  %v2393_v57 = vand.u32 3, %v196_v58  ;;  %v434_v30 = vsub.s32 32, %v433_v4 }
  0x55   :  { %v299_v60 = vsel %vm2327_vm11, %v2169_v22, %v296_v9  ;;  %v187_v3 = vand.u32 2147483647, %v186_v43  ;;  %v2395_v56 = vshrl.u32 %v376_v50, 30  ;;  %v427_v10 = vor.u32 8388608, %v426_v39 }
  0x56   :  { %2043 = vcosq.f32 %v299_v60  ;;  %v439_v33 = vshll.u32 %v2121_v55, %v433_v4  ;;  %v442_v54 = vshll.u32 %v2122_v61, %v433_v4  ;;  %v440_v15 = vshrl.u32 %v2122_v61, %v434_v30 }
  0x57   :  { %2045 = vsinq.f32 %v299_v60  ;;  %v190_v8 = vmul.f32 %v189_v59, %v187_v3  ;;  %v445_v17 = vshll.u32 %v2123_v63, %v433_v4  ;;  %v448_v23 = vshll.u32 %v2124_v2, %v433_v4 }
  0x58   :  { %vm310_vm5 = vcmp.eq.s32.totalorder %v2387_v45, 2  ;;  %vm1140_vm4 = vcmp.eq.s32.totalorder %v2389_v7, 2  ;;  %v378_v25 = vshll.u32 %v2395_v56, 30  ;;  %v2405_v27 = vshrl.u32 %v431_v48, 5 }
  0x59   :  { %v191_v13 = vxor.u32 2147483648, %v190_v8  ;;  %v443_v28 = vshrl.u32 %v2123_v63, %v434_v30  ;;  %v446_v32 = vshrl.u32 %v2124_v2, %v434_v30  ;;  %vm307_vm7 = vcmp.eq.s32.totalorder %v2387_v45, 0 }
  0x5a   :  { %vm1137_vm8 = vcmp.eq.s32.totalorder %v2389_v7, 0  ;;  %v436_v34 = vshll.u32 %v2120_v53, %v433_v4  ;;  %v437_v49 = vshrl.u32 %v2121_v55, %v434_v30  ;;  %v449_v58 = vshrl.u32 %v2125_v11, %v434_v30 }
  0x5b   :  { %v192_v52 = vsel %vm109_vm6, %v191_v13, %v190_v8  ;;  %vm306_vm9 = vcmp.lt.s32.totalorder %v2387_v45, 2  ;;  %vm1136_vm10 = vcmp.lt.s32.totalorder %v2389_v7, 2  ;;  %v2421_v36 = vsub.s32 %v375_v19, %v378_v25 }
  0x5c   :  { %v195_v35 = vsel %vm2333_vm12, %v2161_v16, %v192_v52  ;;  %v441_v18 = vor.u32 %v440_v15, %v439_v33  ;;  %v70_v38 = vcombine.high %v2372_v37, %v2372_v37  ;;  %vm303_vm6 = vweird.f32 %v2169_v22 }
  0x5d   :  { %2047 = vcosq.f32 %v195_v35  ;;  %v444_v46 = vor.u32 %v443_v28, %v442_v54  ;;  %v447_v41 = vor.u32 %v446_v32, %v445_v17  ;;  %v450_v39 = vor.u32 %v449_v58, %v448_v23 }
  0x5e   :  { %2049 = vsinq.f32 %v195_v35  ;;  %v381_v42 = vsub.s32 0, %v2421_v36  ;;  %v435_v5 = vshrl.u32 %v2120_v53, %v434_v30  ;;  %vm451_vm11 = vcmp.lt.s32.totalorder %v2405_v27, 1 }
  0x5f   :  { %v438_v47 = vor.u32 %v437_v49, %v436_v34  ;;  %vm454_vm12 = vcmp.lt.s32.totalorder %v2405_v27, 4  ;;  %v2430_v9 = vshll.u32 %v427_v10, 8  ;;  %v2432_v43 = vrot.slane %v64_v1, 6 }
  0x60   :  { %v371_v59 = vadd.s32 %v2356_v12, %v2365_v29  ;;  %v1945_v24 = vmin.u32 %v381_v42, %v2421_v36  ;;  %vm453_vm14 = vcmp.lt.s32.totalorder %v2405_v27, 3  ;;  %v71_v60 = vrot.slane %v2372_v37, 3 }
  0x61   :  { %vm452_vm15 = vcmp.lt.s32.totalorder %v2405_v27, 2  ;;  %v460_v19 = vsel %vm454_vm12, %v447_v41, 920167782  ;;  %v463_v48 = vsel %vm451_vm11, %v441_v18, %v444_v46  ;;  %v464_v1 = vsel %vm454_vm12, %v450_v39, 1326507024 }
  0x62   :  { %v383_v12 = vclz %v1945_v24  ;;  %v401_v29 = vsub.s32 4, %v2395_v56  ;;  %v455_v4 = vsel %vm451_vm11, %v435_v5, %v438_v47  ;;  %v2451_v50 = vrot.slane %v70_v38, 3 }
  0x63   :  { %v2044_v3 = vpop.eup %2043  ;;  %vm203_vm2 = vcmp.eq.s32.totalorder %v2391_v26, 0  ;;  %vm1034_vm13 = vcmp.eq.s32.totalorder %v2393_v57, 0  ;;  %v456_v10 = vsel %vm454_vm12, %v444_v46, 2102212464  ;;  %v459_v33 = vsel %vm451_vm11, %v438_v47, %v441_v18 }
  0x64   :  { %v2046_v8 = vpop.eup %2045  ;;  %v311_v30 = vxor.u32 2147483648, %v2044_v3  ;;  %v465_v54 = vsel %vm453_vm14, %v447_v41, %v464_v1  ;;  %vm202_vm0 = vcmp.lt.s32.totalorder %v2391_v26, 2  ;;  %vm1033_vm3 = vcmp.lt.s32.totalorder %v2393_v57, 2 }
  0x65   :  { %v308_v13 = vxor.u32 2147483648, %v2046_v8  ;;  %vm317_vm1 = vcmp.lt.s32.totalorder %v2181_v31, 0  ;;  %v1946_v15 = vadd.s32 4294967294, %v383_v12  ;;  %v461_v17 = vsel %vm453_vm14, %v444_v46, %v460_v19 }
  0x66   :  { %v466_v23 = vsel %vm452_vm15, %v463_v48, %v465_v54  ;;  %vm199_vm12 = vweird.f32 %v2161_v16  ;;  %v312_v25 = vsel %vm310_vm5, %v311_v30, %v2046_v8  ;;  %v1142_v28 = vsel %vm1140_vm4, %v311_v30, %v2046_v8 }
  0x67   :  { %v2474_v32 = vmul.u32.u64.low %v2430_v9, %v466_v23  ;;  %v2475_v52 = vmul.u32.u64.high %v2430_v9, %v466_v23, %v2474_v32  ;;  %v309_v34 = vsel %vm307_vm7, %v2044_v3, %v308_v13  ;;  %v1139_v49 = vsel %vm1137_vm8, %v2044_v3, %v308_v13 }
  0x68   :  { %vm1947_vm11 = vcmp.lt.s32.totalorder %v1946_v15, 0  ;;  %v457_v58 = vsel %vm453_vm14, %v441_v18, %v456_v10  ;;  %v313_v35 = vsel %vm306_vm9, %v309_v34, %v312_v25  ;;  %v1143_v38 = vsel %vm1136_vm10, %v1139_v49, %v1142_v28 }
  0x69   :  { %v386_v46 = vsel %vm1947_vm11, 0, %v1946_v15  ;;  %v462_v41 = vsel %vm452_vm15, %v459_v33, %v461_v17  ;;  %v2491_v39 = vsel %vm303_vm6, nan, %v313_v35  ;;  %v2495_v42 = vsel %vm303_vm6, nan, %v1143_v38 }
  0x6a   :  { %v387_v5 = vsub.s32 32, %v386_v46  ;;  %v388_v18 = vshll.u32 %v2421_v36, %v386_v46  ;;  %v1766_v45 = vrot.slane %v2491_v39, 5  ;;  %v1774_v7 = vrot.slane %v2495_v42, 2  ;;  %v2048_v19 = vpop.eup %2047 }
  0x6b   :  { %v1782_v47 = vrot.slane %v2491_v39, 2  ;;  %v1788_v24 = vrot.slane %v2495_v42, 7  ;;  %v1796_v48 = vrot.slane %v2491_v39, 7  ;;  %v391_v3 = vsub.s32 4294967266, %v386_v46  ;;  %v2050_v36 = vpop.eup %2049 }
  0x6c   :  { %v389_v1 = vshrl.u32 %v371_v59, %v387_v5  ;;  %vm3071_vm5 = vcmask 1041408   ;;  %v207_v12 = vxor.u32 2147483648, %v2048_v19  ;;  %1770 = vst [vmem:[#allocation5 + $0x8] sm:$0x38] %v1766_v45  ;;  %v458_v8 = vsel %vm452_vm15, %v455_v4, %v457_v58 }
  0x6d   :  { %v100_v22 = vsel %vm3071_vm5, %v59_v21, %v65_v6  ;;  %1778 = vst [vmem:[#allocation5 + $0x18] ss:$-12 sps:$4 sm:$0xc1] %v1774_v7   ;;  %1786 = vst [vmem:[#allocation5 + $0x18] sm:$0xe] %v1782_v47  ;;  %v2511_v30 = vmul.u32.u64.low %v2430_v9, %v462_v41  ;;  %v2512_v10 = vmul.u32.u64.high %v2430_v9, %v462_v41, %v2511_v30  ;;  %v204_v59 = vxor.u32 2147483648, %v2050_v36 }
  0x6e   :  { %1792 = vst [vmem:[#allocation5 + $0x18] sm:$0x70] %v1788_v24  ;;  %1806 = vst [vmem:[#allocation5 + $0x18] sm:$0x80] %v1796_v48  ;;  %v390_v14 = vor.u32 %v389_v1, %v388_v18  ;;  %v392_v21 = vadd.s32 127, %v391_v3  ;;  %vm3073_vm7 = vcmp.eq.s32.totalorder %v2391_v26, 2  ;;  %v402_v4 = vsel %vm317_vm1, %v401_v29, %v2395_v56 }
  0x6f   :  { %vm3072_vm4 = vmmov %vm3071_vm5  ;;  %v208_v6 = vsel %vm3073_vm7, %v207_v12, %v2050_v36  ;;  %vm3074_vm8 = vcmp.eq.s32.totalorder %v2393_v57, 2  ;;  %vm3075_vm9 = vcmask 1044480   ;;  %v205_v54 = vsel %vm203_vm2, %v2048_v19, %v204_v59 }
  0x70   :  { %v101_v44 = vsel %vm3072_vm4, %v2276_v51, %v2432_v43  ;;  %v1039_v27 = vsel %vm3074_vm8, %v207_v12, %v2050_v36  ;;  %v2530_v33 = vsel %vm3075_vm9, %v100_v22, %v71_v60  ;;  %v1036_v51 = vsel %vm1034_vm13, %v2048_v19, %v204_v59  ;;  %vm3078_vm2 = vmmov %vm3075_vm9 }
  0x71   :  { %v393_v43 = vshll.u32 %v392_v21, 23  ;;  %v474_v13 = vmul.u32 %v2430_v9, %v458_v8  ;;  %v209_v15 = vsel %vm202_vm0, %v205_v54, %v208_v6  ;;  %v1040_v56 = vsel %vm1033_vm3, %v1036_v51, %v1039_v27 }
  0x72   :  { %vm476_vm10 = vc.u32 %v2475_v52, %v2511_v30  ;;  %v477_v37 = vadd.s32 1, %v2512_v10  ;;  %v2546_v60 = vsel %vm199_vm12, nan, %v209_v15  ;;  %v2550_v29 = vsel %vm199_vm12, nan, %v1040_v56 }
  0x73   :  { %v394_v9 = vor.u32 4788187, %v393_v43  ;;  %v397_v17 = vcvt.s32.f32 %v390_v14  ;;  %v1765_v26 = vrot.slane %v2546_v60, 5  ;;  %v1773_v57 = vrot.slane %v2550_v29, 2 }
  0x74   :  { %v1781_v23 = vrot.slane %v2546_v60, 2  ;;  %v1787_v25 = vrot.slane %v2550_v29, 7  ;;  %v1795_v28 = vrot.slane %v2546_v60, 7  ;;  %vm2559_vm0 = vcmp.le.f32.partialorder %v315_v20, 0.7853982 }
  0x75   :  { %v395_v16 = vand.u32 2147483647, %v394_v9  ;;  %v478_v34 = vsel %vm476_vm10, %v477_v37, %v2512_v10  ;;  %1769 = vst [vmem:[#allocation5] sm:$0x38] %v1765_v26  ;;  %v404_v49 = vsel %vm2559_vm0, 0, %v402_v4  ;;  %v2568_v35 = vsel %vm3078_vm2, %v101_v44, %v2451_v50 }
  0x76   :  { %1777 = vst [vmem:[#allocation5 + $0x10] ss:$-12 sps:$4 sm:$0xc1] %v1773_v57   ;;  %1785 = vst [vmem:[#allocation5 + $0x10] sm:$0xe] %v1781_v23  ;;  %v479_v58 = vadd.s32 %v478_v34, %v474_v13  ;;  %v526_v20 = vand.u32 2139095040, %v2530_v33  ;;  %v475_v4 = vadd.s32 %v2511_v30, %v2475_v52  ;;  %vm407_vm11 = vweird.f32 %v2181_v31 }
  0x77   :  { %1791 = vst [vmem:[#allocation5 + $0x10] sm:$0x70] %v1787_v25  ;;  %1805 = vst [vmem:[#allocation5 + $0x10] sm:$0x80] %v1795_v28  ;;  %v398_v38 = vmul.f32 %v397_v17, %v395_v16  ;;  %v523_v46 = vand.u32 2147483647, %v2530_v33 }
  0x78   :  { %v480_v41 = vadd.s32 536870912, %v479_v58  ;;  %v527_v5 = vshrl.u32 %v526_v20, 23  ;;  %v408_v45 = vadd.s32 3, %v404_v49  ;;  %v630_v7 = vand.u32 2139095040, %v2568_v35 }
  0x79   :  { %v399_v18 = vxor.u32 2147483648, %v398_v38  ;;  %v530_v19 = vand.u32 8388607, %v523_v46  ;;  %v2589_v10 = vand.u32 3, %v404_v49  ;;  %v627_v14 = vand.u32 2147483647, %v2568_v35 }
  0x7a   :  { %v2575_v47 = vshrl.u32 %v480_v41, 30  ;;  %v1952_v24 = vadd.s32 4294967169, %v527_v5  ;;  %v631_v36 = vshrl.u32 %v630_v7, 23  ;;  %v2585_v12 = vand.u32 3, %v408_v45 }
  0x7b   :  { %v400_v50 = vsel %vm317_vm1, %v399_v18, %v398_v38  ;;  %v531_v44 = vor.u32 8388608, %v530_v19  ;;  %vm1243_vm13 = vcmp.eq.s32.totalorder %v2589_v10, 2  ;;  %v1811_v51 = vrot.slane %v2550_v29, 4 }
  0x7c   :  { %v403_v1 = vsel %vm2559_vm0, %v2181_v31, %v400_v50  ;;  %v482_v3 = vshll.u32 %v2575_v47, 30  ;;  %v533_v22 = vadd.s32 1, %v1952_v24  ;;  %v1956_v6 = vadd.s32 4294967169, %v631_v36 }
  0x7d   :  { %2051 = vcosq.f32 %v403_v1  ;;  %vm414_vm6 = vcmp.eq.s32.totalorder %v2585_v12, 2  ;;  %vm411_vm14 = vcmp.eq.s32.totalorder %v2585_v12, 0  ;;  %v505_v43 = vsub.s32 4, %v2575_v47 }
  0x7e   :  { %2053 = vsinq.f32 %v403_v1  ;;  %v2587_v8 = vsub.s32 %v479_v58, %v482_v3  ;;  %vm534_vm3 = vcmp.gt.s32.totalorder %v533_v22, 0  ;;  %vm1240_vm15 = vcmp.eq.s32.totalorder %v2589_v10, 0 }
  0x7f   :  { %v535_v59 = vsel %vm534_vm3, %v533_v22, 0  ;;  %v2605_v56 = vand.u32 8388607, %v627_v14  ;;  %vm410_vm1 = vcmp.lt.s32.totalorder %v2585_v12, 2  ;;  %vm1239_vm12 = vcmp.lt.s32.totalorder %v2589_v10, 2 }
  0x80   :  { %v485_v21 = vsub.s32 0, %v2587_v8  ;;  %v537_v27 = vand.u32 31, %v535_v59  ;;  %v2610_v37 = vshll.u32 %v531_v44, 8  ;;  %v2612_v9 = vadd.s32 1, %v1956_v6 }
  0x81   :  { %v2615_v17 = vshrl.u32 %v535_v59, 5  ;;  %vm421_vm0 = vcmp.lt.s32.totalorder %v2292_v40, 0  ;;  %vm2651_vm2 = vcmp.le.f32.partialorder %v419_v62, 0.7853982  ;;  %vm3081_vm3 = vcmask 1040384  }
  0x82   :  { %v1949_v54 = vmin.u32 %v485_v21, %v2587_v8  ;;  %v538_v13 = vsub.s32 32, %v537_v27  ;;  %v540_v15 = vshll.u32 %v2120_v53, %v537_v27  ;;  %v543_v30 = vshll.u32 %v2121_v55, %v537_v27 }
  0x83   :  { %v546_v23 = vshll.u32 %v2122_v61, %v537_v27  ;;  %v549_v16 = vshll.u32 %v2123_v63, %v537_v27  ;;  %v552_v20 = vshll.u32 %v2124_v2, %v537_v27  ;;  %vm555_vm4 = vcmp.lt.s32.totalorder %v2615_v17, 1 }
  0x84   :  { %v487_v52 = vclz %v1949_v54  ;;  %v541_v26 = vshrl.u32 %v2121_v55, %v538_v13  ;;  %v544_v57 = vshrl.u32 %v2122_v61, %v538_v13  ;;  %v547_v32 = vshrl.u32 %v2123_v63, %v538_v13 }
  0x85   :  { %v550_v34 = vshrl.u32 %v2124_v2, %v538_v13  ;;  %v539_v49 = vshrl.u32 %v2120_v53, %v538_v13  ;;  %v553_v38 = vshrl.u32 %v2125_v11, %v538_v13  ;;  %vm556_vm7 = vcmp.lt.s32.totalorder %v2615_v17, 2 }
  0x86   :  { %v1950_v25 = vadd.s32 4294967294, %v487_v52  ;;  %v542_v58 = vor.u32 %v541_v26, %v540_v15  ;;  %v545_v41 = vor.u32 %v544_v57, %v543_v30  ;;  %v548_v5 = vor.u32 %v547_v32, %v546_v23 }
  0x87   :  { %v551_v18 = vor.u32 %v550_v34, %v549_v16  ;;  %v554_v7 = vor.u32 %v553_v38, %v552_v20  ;;  %vm558_vm8 = vcmp.lt.s32.totalorder %v2615_v17, 4  ;;  %vm638_vm9 = vcmp.gt.s32.totalorder %v2612_v9, 0 }
  0x88   :  { %vm1951_vm5 = vcmp.lt.s32.totalorder %v1950_v25, 0  ;;  %vm557_vm10 = vcmp.lt.s32.totalorder %v2615_v17, 3  ;;  %v559_v36 = vsel %vm555_vm4, %v539_v49, %v542_v58  ;;  %v560_v59 = vsel %vm558_vm8, %v548_v5, 2102212464 }
  0x89   :  { %v490_v45 = vsel %vm1951_vm5, 0, %v1950_v25  ;;  %v563_v6 = vsel %vm555_vm4, %v542_v58, %v545_v41  ;;  %v561_v13 = vsel %vm557_vm10, %v545_v41, %v560_v59  ;;  %v564_v15 = vsel %vm558_vm8, %v551_v18, 920167782 }
  0x8a   :  { %v2052_v24 = vpop.eup %2051  ;;  %v491_v50 = vsub.s32 32, %v490_v45  ;;  %v492_v19 = vshll.u32 %v2587_v8, %v490_v45  ;;  %v495_v1 = vsub.s32 4294967266, %v490_v45  ;;  %v565_v32 = vsel %vm557_vm10, %v548_v5, %v564_v15 }
  0x8b   :  { %v2054_v3 = vpop.eup %2053  ;;  %v415_v22 = vxor.u32 2147483648, %v2052_v24  ;;  %v567_v62 = vsel %vm555_vm4, %v545_v41, %v548_v5  ;;  %v1814_v59 = vrot.slane %v2495_v42, 4 }
  0x8c   :  { %v412_v21 = vxor.u32 2147483648, %v2054_v3  ;;  %v493_v44 = vshrl.u32 %v475_v4, %v491_v50  ;;  %v496_v8 = vadd.s32 127, %v495_v1  ;;  %v635_v1 = vor.u32 8388608, %v2605_v56 }
  0x8d   :  { %v416_v27 = vsel %vm414_vm6, %v415_v22, %v2054_v3  ;;  %v1245_v54 = vsel %vm1243_vm13, %v415_v22, %v2054_v3  ;;  %vm3082_vm6 = vcmask 1043456   ;;  %v562_v56 = vsel %vm556_vm7, %v559_v36, %v561_v13 }
  0x8e   :  { %v413_v52 = vsel %vm411_vm14, %v2052_v24, %v412_v21  ;;  %v494_v30 = vor.u32 %v493_v44, %v492_v19  ;;  %v497_v26 = vshll.u32 %v496_v8, 23  ;;  %v1242_v57 = vsel %vm1240_vm15, %v2052_v24, %v412_v21 }
  0x8f   :  { %v417_v23 = vsel %vm410_vm1, %v413_v52, %v416_v27  ;;  %v1246_v25 = vsel %vm1239_vm12, %v1242_v57, %v1245_v54  ;;  %v566_v24 = vsel %vm556_vm7, %v563_v6, %v565_v32  ;;  %v568_v19 = vsel %vm558_vm8, %v554_v7, 1326507024 }
  0x90   :  { %v2667_v16 = vsel %vm407_vm11, nan, %v417_v23  ;;  %v498_v34 = vor.u32 4788187, %v497_v26  ;;  %v501_v49 = vcvt.s32.f32 %v494_v30  ;;  %v2671_v58 = vsel %vm407_vm11, nan, %v1246_v25 }
  0x91   :  { %v1797_v12 = vrot.slane %v2667_v16, 7  ;;  %v1812_v10 = vrot.slane %v2671_v58, 4  ;;  %v1821_v20 = vrot.slane %v2667_v16, 4  ;;  %v1827_v38 = vrot.slane %v2671_v58, 1 }
  0x92   :  { %v499_v45 = vand.u32 2147483647, %v498_v34  ;;  %v1833_v41 = vrot.slane %v2667_v16, 1  ;;  %v1839_v5 = vrot.slane %v2671_v58, 6  ;;  %v569_v60 = vsel %vm557_vm10, %v551_v18, %v568_v19 }
  0x93   :  { %v1798_v31 = vsel %vm3081_vm3, %v1795_v28, %v1797_v12  ;;  %v1813_v50 = vsel %vm3082_vm6, %v1811_v51, %v1812_v10  ;;  %1825 = vst [vmem:[#allocation5 + $0x20] sm:$0xe0] %v1821_v20  ;;  %1831 = vst [vmem:[#allocation5 + $0x30] sm:$0x7] %v1827_v38  ;;  %v2693_v28 = vmul.u32.u64.low %v2610_v37, %v566_v24  ;;  %v2694_v29 = vmul.u32.u64.high %v2610_v37, %v566_v24, %v2693_v28 }
  0x94   :  { %v502_v3 = vmul.f32 %v501_v49, %v499_v45  ;;  %1807 = vst [vmem:[#allocation5 + $0x20] sm:$0x3] %v1798_v31  ;;  %1819 = vst [vmem:[#allocation5 + $0x20] sm:$0x1c] %v1813_v50  ;;  %v506_v51 = vsel %vm421_vm0, %v505_v43, %v2575_v47  ;;  %v570_v7 = vsel %vm556_vm7, %v567_v62, %v569_v60  ;;  %v639_v18 = vsel %vm638_vm9, %v2612_v9, 0 }
  0x95   :  { %1837 = vst [vmem:[#allocation5 + $0x30] sm:$0x38] %v1833_v41  ;;  %1843 = vst [vmem:[#allocation5 + $0x40] ss:$-12 sps:$4 sm:$0xc1] %v1839_v5   ;;  %v2711_v21 = vmul.u32.u64.low %v2610_v37, %v570_v7  ;;  %v2712_v44 = vmul.u32.u64.high %v2610_v37, %v570_v7, %v2711_v21  ;;  %v2714_v8 = vshrl.u32 %v639_v18, 5  ;;  %v578_v6 = vmul.u32 %v2610_v37, %v562_v56 }
  0x96   :  { %v503_v22 = vxor.u32 2147483648, %v502_v3  ;;  %v641_v47 = vand.u32 31, %v639_v18  ;;  %v2716_v43 = vshll.u32 %v635_v1, 8  ;;  %v2719_v36 = vmul.f32 256.0, %v2142_v0 }
  0x97   :  { %v508_v9 = vsel %vm2651_vm2, 0, %v506_v51  ;;  %v581_v27 = vadd.s32 1, %v2694_v29  ;;  %v2732_v52 = vmul.f32 512.0, %v2142_v0  ;;  %vm580_vm13 = vc.u32 %v2712_v44, %v2693_v28 }
  0x98   :  { %v504_v17 = vsel %vm421_vm0, %v503_v22, %v502_v3  ;;  %v642_v13 = vsub.s32 32, %v641_v47  ;;  %v644_v15 = vshll.u32 %v2120_v53, %v641_v47  ;;  %v647_v30 = vshll.u32 %v2121_v55, %v641_v47 }
  0x99   :  { %v507_v54 = vsel %vm2651_vm2, %v2292_v40, %v504_v17  ;;  %v650_v37 = vshll.u32 %v2122_v61, %v641_v47  ;;  %v582_v26 = vsel %vm580_vm13, %v581_v27, %v2694_v29  ;;  %vm659_vm14 = vcmp.lt.s32.totalorder %v2714_v8, 1 }
  0x9a   :  { %2055 = vcosq.f32 %v507_v54  ;;  %v645_v4 = vshrl.u32 %v2121_v55, %v642_v13  ;;  %v583_v57 = vadd.s32 %v582_v26, %v578_v6  ;;  %v648_v23 = vshrl.u32 %v2122_v61, %v642_v13 }
  0x9b   :  { %2057 = vsinq.f32 %v507_v54  ;;  %v651_v0 = vshrl.u32 %v2123_v63, %v642_v13  ;;  %v653_v25 = vshll.u32 %v2123_v63, %v641_v47  ;;  %v654_v62 = vshrl.u32 %v2124_v2, %v642_v13 }
  0x9c   :  { %v646_v32 = vor.u32 %v645_v4, %v644_v15  ;;  %v656_v34 = vshll.u32 %v2124_v2, %v641_v47  ;;  %v657_v49 = vshrl.u32 %v2125_v11, %v642_v13  ;;  %v512_v12 = vadd.s32 3, %v508_v9 }
  0x9d   :  { %v584_v10 = vadd.s32 536870912, %v583_v57  ;;  %v649_v20 = vor.u32 %v648_v23, %v647_v30  ;;  %v652_v38 = vor.u32 %v651_v0, %v650_v37  ;;  %v655_v45 = vor.u32 %v654_v62, %v653_v25 }
  0x9e   :  { %v658_v41 = vor.u32 %v657_v49, %v656_v34  ;;  %vm661_vm15 = vcmp.lt.s32.totalorder %v2714_v8, 3  ;;  %vm662_vm1 = vcmp.lt.s32.totalorder %v2714_v8, 4  ;;  %v1341_v5 = vand.u32 3, %v508_v9 }
  0x9f   :  { %v2749_v24 = vshrl.u32 %v584_v10, 30  ;;  %vm660_vm12 = vcmp.lt.s32.totalorder %v2714_v8, 2  ;;  %v667_v31 = vsel %vm659_vm14, %v646_v32, %v649_v20  ;;  %v643_v50 = vshrl.u32 %v2120_v53, %v642_v13 }
  0xa0   :  { %v668_v19 = vsel %vm662_vm1, %v655_v45, 920167782  ;;  %v671_v1 = vsel %vm659_vm14, %v649_v20, %v652_v38  ;;  %v672_v3 = vsel %vm662_vm1, %v658_v41, 1326507024  ;;  %vm511_vm11 = vweird.f32 %v2292_v40 }
  0xa1   :  { %v586_v60 = vshll.u32 %v2749_v24, 30  ;;  %v664_v29 = vsel %vm662_vm1, %v652_v38, 2102212464  ;;  %v669_v51 = vsel %vm661_vm15, %v652_v38, %v668_v19  ;;  %v80_v56 = vrot.slane %v2732_v52, 5 }
  0xa2   :  { %v513_v7 = vand.u32 3, %v512_v12  ;;  %v670_v18 = vsel %vm660_vm12, %v667_v31, %v669_v51  ;;  %v673_v22 = vsel %vm661_vm15, %v655_v45, %v672_v3  ;;  %v76_v21 = vcombine.high %v2719_v36, %v2719_v36 }
  0xa3   :  { %vm1342_vm5 = vcmp.lt.s32.totalorder %v1341_v5, 2  ;;  %vm1343_vm4 = vcmp.eq.s32.totalorder %v1341_v5, 0  ;;  %v2768_v47 = vsub.s32 %v583_v57, %v586_v60  ;;  %v674_v17 = vsel %vm660_vm12, %v671_v1, %v673_v22 }
  0xa4   :  { %v663_v9 = vsel %vm659_vm14, %v643_v50, %v646_v32  ;;  %v665_v6 = vsel %vm661_vm15, %v649_v20, %v664_v29  ;;  %v2777_v27 = vmul.u32.u64.low %v2716_v43, %v674_v17  ;;  %v2778_v54 = vmul.u32.u64.high %v2716_v43, %v674_v17, %v2777_v27 }
  0xa5   :  { %v589_v13 = vsub.s32 0, %v2768_v47  ;;  %v2782_v15 = vmul.u32.u64.low %v2716_v43, %v670_v18  ;;  %v2783_v30 = vmul.u32.u64.high %v2716_v43, %v670_v18, %v2782_v15  ;;  %vm3083_vm7 = vcmask 1042432  }
  0xa6   :  { %v2788_v37 = vsel %vm3083_vm7, %v2719_v36, %v80_v56  ;;  %vm514_vm8 = vcmp.lt.s32.totalorder %v513_v7, 2  ;;  %vm515_vm9 = vcmp.eq.s32.totalorder %v513_v7, 0  ;;  %vm518_vm10 = vcmp.eq.s32.totalorder %v513_v7, 2  ;;  %vm3088_vm1 = vmmov %vm3083_vm7 }
  0xa7   :  { %v2056_v26 = vpop.eup %2055  ;;  %vm1346_vm0 = vcmp.eq.s32.totalorder %v1341_v5, 2  ;;  %vm525_vm2 = vcmp.lt.s32.totalorder %v2530_v33, 0  ;;  %v1953_v23 = vmin.u32 %v589_v13, %v2768_v47  ;;  %v666_v0 = vsel %vm660_vm12, %v663_v9, %v665_v6 }
  0xa8   :  { %v2058_v4 = vpop.eup %2057  ;;  %v519_v57 = vxor.u32 2147483648, %v2056_v26  ;;  %v79_v25 = vcombine.high %v2732_v52, %v2732_v52  ;;  %v579_v62 = vadd.s32 %v2693_v28, %v2712_v44  ;;  %v731_v34 = vand.u32 2147483647, %v2788_v37 }
  0xa9   :  { %v516_v32 = vxor.u32 2147483648, %v2058_v4  ;;  %v734_v49 = vand.u32 2139095040, %v2788_v37  ;;  %v591_v20 = vclz %v1953_v23  ;;  %v609_v38 = vsub.s32 4, %v2749_v24 }
  0xaa   :  { %v520_v12 = vsel %vm518_vm10, %v519_v57, %v2058_v4  ;;  %v1348_v10 = vsel %vm1346_vm0, %v519_v57, %v2058_v4  ;;  %v682_v41 = vmul.u32 %v2716_v43, %v666_v0  ;;  %vm684_vm3 = vc.u32 %v2778_v54, %v2782_v15 }
  0xab   :  { %v517_v45 = vsel %vm515_vm9, %v2056_v26, %v516_v32  ;;  %v1345_v8 = vsel %vm1343_vm4, %v2056_v26, %v516_v32  ;;  %v1954_v52 = vadd.s32 4294967294, %v591_v20  ;;  %v685_v31 = vadd.s32 1, %v2783_v30 }
  0xac   :  { %v521_v28 = vsel %vm514_vm8, %v517_v45, %v520_v12  ;;  %v1349_v44 = vsel %vm1342_vm5, %v1345_v8, %v1348_v10  ;;  %v735_v1 = vshrl.u32 %v734_v49, 23  ;;  %v81_v43 = vrot.slane %v79_v25, 5 }
  0xad   :  { %v2811_v50 = vsel %vm511_vm11, nan, %v521_v28  ;;  %v2815_v19 = vsel %vm511_vm11, nan, %v1349_v44  ;;  %vm1955_vm6 = vcmp.lt.s32.totalorder %v1954_v52, 0  ;;  %v686_v40 = vsel %vm684_vm3, %v685_v31, %v2783_v30 }
  0xae   :  { %v1799_v3 = vrot.slane %v2811_v50, 7  ;;  %v1815_v60 = vrot.slane %v2815_v19, 4  ;;  %v1822_v5 = vrot.slane %v2811_v50, 4  ;;  %v1828_v29 = vrot.slane %v2815_v19, 1 }
  0xaf   :  { %v1834_v51 = vrot.slane %v2811_v50, 1  ;;  %v1840_v56 = vrot.slane %v2815_v19, 6  ;;  %vm3084_vm13 = vcmask 1040384   ;;  %vm3085_vm14 = vcmask 1043456  }
  0xb0   :  { %v1800_v7 = vsel %vm3084_vm13, %v1796_v48, %v1799_v3  ;;  %v1816_v18 = vsel %vm3085_vm14, %v1814_v59, %v1815_v60  ;;  %1826 = vst [vmem:[#allocation5 + $0x28] sm:$0xe0] %v1822_v5  ;;  %1832 = vst [vmem:[#allocation5 + $0x38] sm:$0x7] %v1828_v29  ;;  %v594_v22 = vsel %vm1955_vm6, 0, %v1954_v52  ;;  %v687_v17 = vadd.s32 %v686_v40, %v682_v41 }
  0xb1   :  { %1808 = vst [vmem:[#allocation5 + $0x28] sm:$0x3] %v1800_v7  ;;  %1820 = vst [vmem:[#allocation5 + $0x28] sm:$0x1c] %v1816_v18  ;;  %v595_v9 = vsub.s32 32, %v594_v22  ;;  %v596_v6 = vshll.u32 %v2768_v47, %v594_v22  ;;  %v599_v27 = vsub.s32 4294967266, %v594_v22  ;;  %v610_v39 = vsel %vm525_vm2, %v609_v38, %v2749_v24 }
  0xb2   :  { %1838 = vst [vmem:[#allocation5 + $0x38] sm:$0x38] %v1834_v51  ;;  %1844 = vst [vmem:[#allocation5 + $0x48] ss:$-12 sps:$4 sm:$0xc1] %v1840_v56   ;;  %v688_v48 = vadd.s32 536870912, %v687_v17  ;;  %v2847_v47 = vsel %vm3088_vm1, %v76_v21, %v81_v43  ;;  %v683_v31 = vadd.s32 %v2782_v15, %v2778_v54  ;;  %vm615_vm3 = vweird.f32 %v2530_v33 }
  0xb3   :  { %v1960_v42 = vadd.s32 4294967169, %v735_v1  ;;  %vm2839_vm15 = vcmp.le.f32.partialorder %v523_v46, 0.7853982  ;;  %v597_v13 = vshrl.u32 %v579_v62, %v595_v9  ;;  %v600_v30 = vadd.s32 127, %v599_v27 }
  0xb4   :  { %v612_v26 = vsel %vm2839_vm15, 0, %v610_v39  ;;  %v2851_v24 = vshrl.u32 %v688_v48, 30  ;;  %v738_v4 = vand.u32 8388607, %v731_v34  ;;  %v838_v25 = vand.u32 2139095040, %v2847_v47 }
  0xb5   :  { %v741_v46 = vadd.s32 1, %v1960_v42  ;;  %v598_v57 = vor.u32 %v597_v13, %v596_v6  ;;  %v601_v23 = vshll.u32 %v600_v30, 23  ;;  %v616_v21 = vadd.s32 3, %v612_v26 }
  0xb6   :  { %v690_v0 = vshll.u32 %v2851_v24, 30  ;;  %v739_v12 = vor.u32 8388608, %v738_v4  ;;  %v1849_v38 = vrot.slane %v2667_v16, 6  ;;  %v1861_v8 = vrot.slane %v2671_v58, 3 }
  0xb7   :  { %vm742_vm12 = vcmp.gt.s32.totalorder %v741_v46, 0  ;;  %v602_v36 = vor.u32 4788187, %v601_v23  ;;  %v605_v32 = vcvt.s32.f32 %v598_v57  ;;  %v839_v28 = vshrl.u32 %v838_v25, 23 }
  0xb8   :  { %v743_v62 = vsel %vm742_vm12, %v741_v46, 0  ;;  %v2857_v49 = vsub.s32 %v687_v17, %v690_v0  ;;  %v2862_v52 = vand.u32 3, %v616_v21  ;;  %v2866_v1 = vand.u32 3, %v612_v26 }
  0xb9   :  { %v745_v10 = vand.u32 31, %v743_v62  ;;  %v603_v20 = vand.u32 2147483647, %v602_v36  ;;  %v713_v3 = vsub.s32 4, %v2851_v24  ;;  %v2870_v60 = vshll.u32 %v739_v12, 8 }
  0xba   :  { %v693_v45 = vsub.s32 0, %v2857_v49  ;;  %v835_v5 = vand.u32 2147483647, %v2847_v47  ;;  %v744_v18 = vshrl.u32 %v743_v62, 5  ;;  %v1964_v15 = vadd.s32 4294967169, %v839_v28 }
  0xbb   :  { %v746_v41 = vsub.s32 32, %v745_v10  ;;  %v606_v44 = vmul.f32 %v605_v32, %v603_v20  ;;  %v748_v51 = vshll.u32 %v2120_v53, %v745_v10  ;;  %v751_v40 = vshll.u32 %v2121_v55, %v745_v10 }
  0xbc   :  { %v1957_v43 = vmin.u32 %v693_v45, %v2857_v49  ;;  %v754_v54 = vshll.u32 %v2122_v61, %v745_v10  ;;  %vm629_vm11 = vcmp.lt.s32.totalorder %v2568_v35, 0  ;;  %v757_v48 = vshll.u32 %v2123_v63, %v745_v10 }
  0xbd   :  { %v607_v29 = vxor.u32 2147483648, %v606_v44  ;;  %v749_v56 = vshrl.u32 %v2121_v55, %v746_v41  ;;  %v747_v17 = vshrl.u32 %v2120_v53, %v746_v41  ;;  %v752_v9 = vshrl.u32 %v2122_v61, %v746_v41 }
  0xbe   :  { %v695_v7 = vclz %v1957_v43  ;;  %v755_v6 = vshrl.u32 %v2123_v63, %v746_v41  ;;  %v758_v42 = vshrl.u32 %v2124_v2, %v746_v41  ;;  %v760_v26 = vshll.u32 %v2124_v2, %v745_v10 }
  0xbf   :  { %v608_v22 = vsel %vm525_vm2, %v607_v29, %v606_v44  ;;  %v750_v13 = vor.u32 %v749_v56, %v748_v51  ;;  %v753_v30 = vor.u32 %v752_v9, %v751_v40  ;;  %v761_v46 = vshrl.u32 %v2125_v11, %v746_v41 }
  0xc0   :  { %v611_v27 = vsel %vm2839_vm15, %v2530_v33, %v608_v22  ;;  %v1958_v39 = vadd.s32 4294967294, %v695_v7  ;;  %v759_v4 = vor.u32 %v758_v42, %v757_v48  ;;  %vm2892_vm4 = vcmp.le.f32.partialorder %v627_v14, 0.7853982 }
  0xc1   :  { %2059 = vcosq.f32 %v611_v27  ;;  %v756_v23 = vor.u32 %v755_v6, %v754_v54  ;;  %vm763_vm7 = vcmp.lt.s32.totalorder %v744_v18, 1  ;;  %vm765_vm8 = vcmp.lt.s32.totalorder %v744_v18, 3 }
  0xc2   :  { %2061 = vsinq.f32 %v611_v27  ;;  %vm1959_vm5 = vcmp.lt.s32.totalorder %v1958_v39, 0  ;;  %v762_v32 = vor.u32 %v761_v46, %v760_v26  ;;  %vm764_vm9 = vcmp.lt.s32.totalorder %v744_v18, 2 }
  0xc3   :  { %v698_v57 = vsel %vm1959_vm5, 0, %v1958_v39  ;;  %vm766_vm10 = vcmp.lt.s32.totalorder %v744_v18, 4  ;;  %v767_v21 = vsel %vm763_vm7, %v747_v17, %v750_v13  ;;  %v771_v62 = vsel %vm763_vm7, %v750_v13, %v753_v30 }
  0xc4   :  { %v699_v0 = vsub.s32 32, %v698_v57  ;;  %v700_v25 = vshll.u32 %v2857_v49, %v698_v57  ;;  %v703_v36 = vsub.s32 4294967266, %v698_v57  ;;  %v768_v10 = vsel %vm766_vm10, %v756_v23, 2102212464 }
  0xc5   :  { %v772_v20 = vsel %vm766_vm10, %v759_v4, 920167782  ;;  %v769_v45 = vsel %vm765_vm8, %v753_v30, %v768_v10  ;;  %v775_v28 = vsel %vm763_vm7, %v753_v30, %v756_v23  ;;  %v776_v44 = vsel %vm766_vm10, %v762_v32, 1326507024 }
  0xc6   :  { %v701_v12 = vshrl.u32 %v683_v31, %v699_v0  ;;  %v704_v14 = vadd.s32 127, %v703_v36  ;;  %v773_v41 = vsel %vm765_vm8, %v756_v23, %v772_v20  ;;  %vm618_vm0 = vcmp.lt.s32.totalorder %v2862_v52, 2 }
  0xc7   :  { %v714_v29 = vsel %vm629_vm11, %v713_v3, %v2851_v24  ;;  %vm1445_vm2 = vcmp.lt.s32.totalorder %v2866_v1, 2  ;;  %v774_v31 = vsel %vm764_vm9, %v771_v62, %v773_v41  ;;  %v770_v51 = vsel %vm764_vm9, %v767_v21, %v769_v45 }
  0xc8   :  { %v702_v49 = vor.u32 %v701_v12, %v700_v25  ;;  %v705_v43 = vshll.u32 %v704_v14, 23  ;;  %v777_v56 = vsel %vm765_vm8, %v759_v4, %v776_v44  ;;  %v845_v24 = vadd.s32 1, %v1964_v15 }
  0xc9   :  { %v2912_v40 = vmul.u32.u64.low %v2870_v60, %v774_v31  ;;  %v2913_v7 = vmul.u32.u64.high %v2870_v60, %v774_v31, %v2912_v40  ;;  %v778_v17 = vsel %vm764_vm9, %v775_v28, %v777_v56  ;;  %vm619_vm6 = vcmp.eq.s32.totalorder %v2862_v52, 0 }
  0xca   :  { %v706_v54 = vor.u32 4788187, %v705_v43  ;;  %v709_v22 = vcvt.s32.f32 %v702_v49  ;;  %vm622_vm13 = vcmp.eq.s32.totalorder %v2862_v52, 2  ;;  %v716_v27 = vsel %vm2892_vm4, 0, %v714_v29 }
  0xcb   :  { %v2920_v3 = vmul.u32.u64.low %v2870_v60, %v778_v17  ;;  %v2921_v9 = vmul.u32.u64.high %v2870_v60, %v778_v17, %v2920_v3  ;;  %vm1446_vm14 = vcmp.eq.s32.totalorder %v2866_v1, 0  ;;  %vm846_vm15 = vcmp.gt.s32.totalorder %v845_v24, 0 }
  0xcc   :  { %v707_v6 = vand.u32 2147483647, %v706_v54  ;;  %v786_v39 = vmul.u32 %v2870_v60, %v770_v51  ;;  %v789_v18 = vadd.s32 1, %v2913_v7  ;;  %v2930_v15 = vand.u32 8388607, %v835_v5 }
  0xcd   :  { %v847_v48 = vsel %vm846_vm15, %v845_v24, 0  ;;  %v1852_v30 = vrot.slane %v2811_v50, 6  ;;  %vm1449_vm1 = vcmp.eq.s32.totalorder %v2866_v1, 2  ;;  %v720_v57 = vadd.s32 3, %v716_v27 }
  0xce   :  { %v2060_v42 = vpop.eup %2059  ;;  %v710_v13 = vmul.f32 %v709_v22, %v707_v6  ;;  %v849_v26 = vand.u32 31, %v847_v48  ;;  %v2934_v23 = vand.u32 3, %v716_v27  ;;  %vm788_vm12 = vc.u32 %v2921_v9, %v2912_v40 }
  0xcf   :  { %v2062_v4 = vpop.eup %2061  ;;  %v623_v46 = vxor.u32 2147483648, %v2060_v42  ;;  %v790_v25 = vsel %vm788_vm12, %v789_v18, %v2913_v7  ;;  %v843_v12 = vor.u32 8388608, %v2930_v15  ;;  %v848_v1 = vshrl.u32 %v847_v48, 5 }
  0xd0   :  { %v620_v60 = vxor.u32 2147483648, %v2062_v4  ;;  %v711_v0 = vxor.u32 2147483648, %v710_v13  ;;  %v850_v36 = vsub.s32 32, %v849_v26  ;;  %v791_v62 = vadd.s32 %v790_v25, %v786_v39 }
  0xd1   :  { %v624_v32 = vsel %vm622_vm13, %v623_v46, %v2062_v4  ;;  %v1451_v21 = vsel %vm1449_vm1, %v623_v46, %v2062_v4  ;;  %v852_v45 = vshll.u32 %v2120_v53, %v849_v26  ;;  %v855_v54 = vshll.u32 %v2121_v55, %v849_v26 }
  0xd2   :  { %v621_v14 = vsel %vm619_vm6, %v2060_v42, %v620_v60  ;;  %v712_v10 = vsel %vm629_vm11, %v711_v0, %v710_v13  ;;  %v1448_v20 = vsel %vm1446_vm14, %v2060_v42, %v620_v60  ;;  %v792_v49 = vadd.s32 536870912, %v791_v62 }
  0xd3   :  { %v625_v41 = vsel %vm618_vm0, %v621_v14, %v624_v32  ;;  %v715_v28 = vsel %vm2892_vm4, %v2568_v35, %v712_v10  ;;  %v1452_v44 = vsel %vm1445_vm2, %v1448_v20, %v1451_v21  ;;  %v853_v31 = vshrl.u32 %v2121_v55, %v850_v36 }
  0xd4   :  { %v626_v43 = vsel %vm615_vm3, nan, %v625_v41  ;;  %2063 = vcosq.f32 %v715_v28  ;;  %v1453_v29 = vsel %vm615_vm3, nan, %v1452_v44  ;;  %v2961_v7 = vshrl.u32 %v792_v49, 30 }
  0xd5   :  { %2065 = vsinq.f32 %v715_v28  ;;  %v1850_v52 = vrot.slane %v626_v43, 6  ;;  %1881 = vst [vmem:[#allocation5 + $0x50] sm:$0xe0] %v626_v43  ;;  %v1862_v51 = vrot.slane %v1453_v29, 3  ;;  %1879 = vst [vmem:[#allocation5 + $0x50] sm:$0x1c] %v1453_v29  ;;  %v856_v17 = vshrl.u32 %v2122_v61, %v850_v36 }
  0xd6   :  { %v1871_v59 = vrot.slane %v626_v43, 3  ;;  %v1883_v56 = vrot.slane %v1453_v29, 5  ;;  %vm3091_vm11 = vcmask 1041408   ;;  %vm3092_vm5 = vcmask 1044480  }
  0xd7   :  { %v1851_v22 = vsel %vm3091_vm11, %v1849_v38, %v1850_v52  ;;  %v1863_v33 = vsel %vm3092_vm5, %v1861_v8, %v1862_v51  ;;  %v858_v24 = vshll.u32 %v2122_v61, %v849_v26  ;;  %v794_v3 = vshll.u32 %v2961_v7, 30  ;;  %vm3093_vm12 = vmmov %vm3091_vm11 }
  0xd8   :  { %1875 = vst [vmem:[#allocation5 + $0x50] ss:$-12 sps:$4 sm:$0x83] %v1871_v59   ;;  %1857 = vst [vmem:[#allocation5 + $0x40] sm:$0xe] %v1851_v22  ;;  %v854_v6 = vor.u32 %v853_v31, %v852_v45  ;;  %v859_v55 = vshrl.u32 %v2123_v63, %v850_v36  ;;  %v861_v16 = vshll.u32 %v2123_v63, %v849_v26  ;;  %vm867_vm4 = vcmp.lt.s32.totalorder %v848_v1, 1 }
  0xd9   :  { %1869 = vst [vmem:[#allocation5 + $0x40] sm:$0x70] %v1863_v33  ;;  %1887 = vst [vmem:[#allocation5 + $0x60] sm:$0x7] %v1883_v56  ;;  %v857_v38 = vor.u32 %v856_v17, %v855_v54  ;;  %v862_v58 = vshrl.u32 %v2124_v2, %v850_v36  ;;  %v864_v8 = vshll.u32 %v2124_v2, %v849_v26  ;;  %v721_v15 = vand.u32 3, %v720_v57 }
  0xda   :  { %v865_v27 = vshrl.u32 %v2125_v11, %v850_v36  ;;  %v2978_v39 = vsub.s32 %v791_v62, %v794_v3  ;;  %v851_v61 = vshrl.u32 %v2120_v53, %v850_v36  ;;  %v860_v18 = vor.u32 %v859_v55, %v858_v24  ;;  %vm3094_vm11 = vmmov %vm3092_vm5 }
  0xdb   :  { %v1864_v48 = vrot.slane %v2815_v19, 3  ;;  %v863_v42 = vor.u32 %v862_v58, %v861_v16  ;;  %vm719_vm7 = vweird.f32 %v2568_v35  ;;  %vm868_vm8 = vcmp.lt.s32.totalorder %v848_v1, 2 }
  0xdc   :  { %v866_v13 = vor.u32 %v865_v27, %v864_v8  ;;  %v797_v63 = vsub.s32 0, %v2978_v39  ;;  %vm869_vm9 = vcmp.lt.s32.totalorder %v848_v1, 3  ;;  %vm870_vm10 = vcmp.lt.s32.totalorder %v848_v1, 4 }
  0xdd   :  { %v872_v2 = vsel %vm870_vm10, %v860_v18, 2102212464  ;;  %v875_v11 = vsel %vm867_vm4, %v854_v6, %v857_v38  ;;  %v876_v26 = vsel %vm870_vm10, %v863_v42, 920167782  ;;  %v883_v4 = vshll.u32 %v843_v12, 8 }
  0xde   :  { %vm1548_vm0 = vcmp.lt.s32.totalorder %v2934_v23, 2  ;;  %v1961_v53 = vmin.u32 %v797_v63, %v2978_v39  ;;  %v871_v46 = vsel %vm867_vm4, %v851_v61, %v854_v6  ;;  %v877_v57 = vsel %vm869_vm9, %v860_v18, %v876_v26 }
  0xdf   :  { %v873_v60 = vsel %vm869_vm9, %v857_v38, %v872_v2  ;;  %v878_v0 = vsel %vm868_vm8, %v875_v11, %v877_v57  ;;  %v879_v25 = vsel %vm867_vm4, %v857_v38, %v860_v18  ;;  %v880_v36 = vsel %vm870_vm10, %v866_v13, 1326507024 }
  0xe0   :  { %vm723_vm2 = vcmp.eq.s32.totalorder %v721_v15, 0  ;;  %vm1549_vm3 = vcmp.eq.s32.totalorder %v2934_v23, 0  ;;  %vm1552_vm6 = vcmp.eq.s32.totalorder %v2934_v23, 2  ;;  %v799_v32 = vclz %v1961_v53 }
  0xe1   :  { %v2064_v21 = vpop.eup %2063  ;;  %vm726_vm13 = vcmp.eq.s32.totalorder %v721_v15, 2  ;;  %v881_v62 = vsel %vm869_vm9, %v863_v42, %v880_v36  ;;  %v2995_v12 = vmul.u32.u64.low %v883_v4, %v878_v0  ;;  %v2996_v14 = vmul.u32.u64.high %v883_v4, %v878_v0, %v2995_v12 }
  0xe2   :  { %v2066_v10 = vpop.eup %2065  ;;  %v727_v20 = vxor.u32 2147483648, %v2064_v21  ;;  %v1962_v45 = vadd.s32 4294967294, %v799_v32  ;;  %v874_v41 = vsel %vm868_vm8, %v871_v46, %v873_v60  ;;  %v882_v28 = vsel %vm868_vm8, %v879_v25, %v881_v62 }
  0xe3   :  { %vm722_vm14 = vcmp.lt.s32.totalorder %v721_v15, 2  ;;  %v724_v44 = vxor.u32 2147483648, %v2066_v10  ;;  %v3001_v49 = vmul.u32.u64.low %v883_v4, %v882_v28  ;;  %v3002_v43 = vmul.u32.u64.high %v883_v4, %v882_v28, %v3001_v49 }
  0xe4   :  { %v728_v29 = vsel %vm726_vm13, %v727_v20, %v2066_v10  ;;  %v1554_v31 = vsel %vm1552_vm6, %v727_v20, %v2066_v10  ;;  %v787_v52 = vadd.s32 %v2912_v40, %v2921_v9  ;;  %vm1963_vm15 = vcmp.lt.s32.totalorder %v1962_v45, 0 }
  0xe5   :  { %v725_v51 = vsel %vm723_vm2, %v2064_v21, %v724_v44  ;;  %v1551_v59 = vsel %vm1549_vm3, %v2064_v21, %v724_v44  ;;  %v802_v56 = vsel %vm1963_vm15, 0, %v1962_v45  ;;  %v890_v1 = vmul.u32 %v883_v4, %v874_v41 }
  0xe6   :  { %v729_v54 = vsel %vm722_vm14, %v725_v51, %v728_v29  ;;  %v1555_v22 = vsel %vm1548_vm0, %v1551_v59, %v1554_v31  ;;  %v803_v33 = vsub.s32 32, %v802_v56  ;;  %v893_v17 = vadd.s32 1, %v2996_v14 }
  0xe7   :  { %v730_v24 = vsel %vm719_vm7, nan, %v729_v54  ;;  %v1556_v40 = vsel %vm719_vm7, nan, %v1555_v22  ;;  %v804_v9 = vshll.u32 %v2978_v39, %v802_v56  ;;  %v807_v3 = vsub.s32 4294967266, %v802_v56 }
  0xe8   :  { %v1853_v6 = vrot.slane %v730_v24, 6  ;;  %1882 = vst [vmem:[#allocation5 + $0x58] sm:$0xe0] %v730_v24  ;;  %v1865_v55 = vrot.slane %v1556_v40, 3  ;;  %1880 = vst [vmem:[#allocation5 + $0x58] sm:$0x1c] %v1556_v40  ;;  %v805_v23 = vshrl.u32 %v787_v52, %v803_v33  ;;  %vm892_vm1 = vc.u32 %v3002_v43, %v2995_v12 }
  0xe9   :  { %v1872_v16 = vrot.slane %v730_v24, 3  ;;  %v1884_v38 = vrot.slane %v1556_v40, 5  ;;  %v808_v58 = vadd.s32 127, %v807_v3  ;;  %v894_v27 = vsel %vm892_vm1, %v893_v17, %v2996_v14 }
  0xea   :  { %v1854_v8 = vsel %vm3093_vm12, %v1852_v30, %v1853_v6  ;;  %v1866_v35 = vsel %vm3094_vm11, %v1864_v48, %v1865_v55  ;;  %v806_v39 = vor.u32 %v805_v23, %v804_v9  ;;  %v895_v18 = vadd.s32 %v894_v27, %v890_v1 }
  0xeb   :  { %1876 = vst [vmem:[#allocation5 + $0x58] ss:$-12 sps:$4 sm:$0x83] %v1872_v16   ;;  %1888 = vst [vmem:[#allocation5 + $0x68] sm:$0x7] %v1884_v38  ;;  %v809_v61 = vshll.u32 %v808_v58, 23  ;;  %v891_v32 = vadd.s32 %v2995_v12, %v3002_v43  ;;  %vm823_vm6 = vweird.f32 %v2788_v37 }
  0xec   :  { %1858 = vst [vmem:[#allocation5 + $0x48] sm:$0xe] %v1854_v8  ;;  %1870 = vst [vmem:[#allocation5 + $0x48] sm:$0x70] %v1866_v35  ;;  %v813_v42 = vcvt.s32.f32 %v806_v39  ;;  %v896_v13 = vadd.s32 536870912, %v895_v18  ;;  %vm733_vm5 = vcmp.lt.s32.totalorder %v2788_v37, 0 }
  0xed   :  { %v810_v15 = vor.u32 4788187, %v809_v61  ;;  %v817_v48 = vsub.s32 4, %v2961_v7  ;;  %vm732_vm4 = vcmp.le.f32.partialorder %v731_v34, 0.7853982  ;;  %vm837_vm13 = vcmp.lt.s32.totalorder %v2847_v47, 0 }
  0xee   :  { %v3028_v50 = vshrl.u32 %v896_v13, 30  ;;  %vm3043_vm14 = vcmp.le.f32.partialorder %v835_v5, 0.7853982 }
  0xef   :  { %v811_v63 = vand.u32 2147483647, %v810_v15  ;;  %v818_v53 = vsel %vm733_vm5, %v817_v48, %v2961_v7 }
  0xf0   :  { %v898_v19 = vshll.u32 %v3028_v50, 30  ;;  %v820_v60 = vsel %vm732_vm4, 0, %v818_v53  ;;  %v921_v40 = vsub.s32 4, %v3028_v50 }
  0xf1   :  { %v814_v30 = vmul.f32 %v813_v42, %v811_v63  ;;  %v824_v36 = vadd.s32 3, %v820_v60  ;;  %v1650_v20 = vand.u32 3, %v820_v60 }
  0xf2   :  { %v899_v11 = vsub.s32 %v895_v18, %v898_v19  ;;  %v922_v5 = vsel %vm837_vm13, %v921_v40, %v3028_v50 }
  0xf3   :  { %v815_v2 = vxor.u32 2147483648, %v814_v30  ;;  %v825_v10 = vand.u32 3, %v824_v36  ;;  %vm1655_vm10 = vcmp.eq.s32.totalorder %v1650_v20, 2  ;;  %vm1652_vm0 = vcmp.eq.s32.totalorder %v1650_v20, 0 }
  0xf4   :  { %v901_v4 = vsub.s32 0, %v899_v11  ;;  %vm1651_vm3 = vcmp.lt.s32.totalorder %v1650_v20, 2  ;;  %v924_v58 = vsel %vm3043_vm14, 0, %v922_v5 }
  0xf5   :  { %v816_v26 = vsel %vm733_vm5, %v815_v2, %v814_v30  ;;  %vm827_vm8 = vcmp.eq.s32.totalorder %v825_v10, 0  ;;  %vm830_vm9 = vcmp.eq.s32.totalorder %v825_v10, 2  ;;  %vm826_vm2 = vcmp.lt.s32.totalorder %v825_v10, 2 }
  0xf6   :  { %v819_v46 = vsel %vm732_vm4, %v2788_v37, %v816_v26  ;;  %v1965_v57 = vmin.u32 %v901_v4, %v899_v11  ;;  %v928_v8 = vadd.s32 3, %v924_v58  ;;  %v1753_v27 = vand.u32 3, %v924_v58 }
  0xf7   :  { %2067 = vcosq.f32 %v819_v46 }
  0xf8   :  { %2069 = vsinq.f32 %v819_v46  ;;  %v903_v0 = vclz %v1965_v57  ;;  %v929_v35 = vand.u32 3, %v928_v8  ;;  %vm1758_vm1 = vcmp.eq.s32.totalorder %v1753_v27, 2 }
  0xf9   :  { %vm1755_vm11 = vcmp.eq.s32.totalorder %v1753_v27, 0  ;;  %vm1754_vm4 = vcmp.lt.s32.totalorder %v1753_v27, 2 }
  0xfa   :  { %v1966_v25 = vadd.s32 4294967294, %v903_v0  ;;  %vm934_vm15 = vcmp.eq.s32.totalorder %v929_v35, 2  ;;  %vm931_vm12 = vcmp.eq.s32.totalorder %v929_v35, 0  ;;  %vm930_vm5 = vcmp.lt.s32.totalorder %v929_v35, 2 }
  0xfc   :  { %vm1967_vm7 = vcmp.lt.s32.totalorder %v1966_v25, 0 }
  0xfd   :  { %v906_v34 = vsel %vm1967_vm7, 0, %v1966_v25  ;;  %vm927_vm7 = vweird.f32 %v2847_v47 }
  0xfe   :  { %v907_v21 = vsub.s32 32, %v906_v34  ;;  %v908_v62 = vshll.u32 %v899_v11, %v906_v34  ;;  %v911_v14 = vsub.s32 4294967266, %v906_v34 }
 0x100   :  { %v909_v7 = vshrl.u32 %v891_v32, %v907_v21  ;;  %v912_v45 = vadd.s32 127, %v911_v14 }
 0x102   :  { %v910_v41 = vor.u32 %v909_v7, %v908_v62  ;;  %v913_v28 = vshll.u32 %v912_v45, 23 }
 0x104   :  { %v2068_v44 = vpop.eup %2067  ;;  %v914_v31 = vor.u32 4788187, %v913_v28  ;;  %v917_v52 = vcvt.s32.f32 %v910_v41 }
 0x105   :  { %v2070_v49 = vpop.eup %2069  ;;  %v831_v29 = vxor.u32 2147483648, %v2068_v44 }
 0x106   :  { %v828_v12 = vxor.u32 2147483648, %v2070_v49  ;;  %v915_v51 = vand.u32 2147483647, %v914_v31 }
 0x107   :  { %v832_v43 = vsel %vm830_vm9, %v831_v29, %v2070_v49  ;;  %v1657_v59 = vsel %vm1655_vm10, %v831_v29, %v2070_v49 }
 0x108   :  { %v829_v56 = vsel %vm827_vm8, %v2068_v44, %v828_v12  ;;  %v1654_v1 = vsel %vm1652_vm0, %v2068_v44, %v828_v12  ;;  %v918_v22 = vmul.f32 %v917_v52, %v915_v51 }
 0x109   :  { %v833_v54 = vsel %vm826_vm2, %v829_v56, %v832_v43  ;;  %v1658_v33 = vsel %vm1651_vm3, %v1654_v1, %v1657_v59 }
 0x10a   :  { %v834_v17 = vsel %vm823_vm6, nan, %v833_v54  ;;  %v1659_v37 = vsel %vm823_vm6, nan, %v1658_v33  ;;  %v919_v3 = vxor.u32 2147483648, %v918_v22 }
 0x10b   :  { %v1891_v9 = vrot.slane %v834_v17, 5  ;;  %v1899_v6 = vrot.slane %v1659_v37, 2  ;;  %v1907_v55 = vrot.slane %v834_v17, 2  ;;  %v1913_v16 = vrot.slane %v1659_v37, 7 }
 0x10c   :  { %v920_v38 = vsel %vm837_vm13, %v919_v3, %v918_v22 }
 0x10d   :  { %1895 = vst [vmem:[#allocation5 + $0x60] sm:$0x38] %v1891_v9  ;;  %1903 = vst [vmem:[#allocation5 + $0x70] ss:$-12 sps:$4 sm:$0xc1] %v1899_v6   ;;  %v923_v23 = vsel %vm3043_vm14, %v2847_v47, %v920_v38 }
 0x10e   :  { %1911 = vst [vmem:[#allocation5 + $0x70] sm:$0xe] %v1907_v55  ;;  %1917 = vst [vmem:[#allocation5 + $0x70] sm:$0x70] %v1913_v16  ;;  %2071 = vcosq.f32 %v923_v23 }
 0x10f   :  { %2073 = vsinq.f32 %v923_v23 }
 0x11b   :  { %v2072_v39 = vpop.eup %2071 }
 0x11c   :  { %v2074_v61 = vpop.eup %2073  ;;  %v935_v18 = vxor.u32 2147483648, %v2072_v39 }
 0x11d   :  { %v932_v15 = vxor.u32 2147483648, %v2074_v61 }
 0x11e   :  { %v936_v42 = vsel %vm934_vm15, %v935_v18, %v2074_v61  ;;  %v1760_v13 = vsel %vm1758_vm1, %v935_v18, %v2074_v61 }
 0x11f   :  { %v933_v63 = vsel %vm931_vm12, %v2072_v39, %v932_v15  ;;  %v1757_v50 = vsel %vm1755_vm11, %v2072_v39, %v932_v15 }
 0x120   :  { %v937_v30 = vsel %vm930_vm5, %v933_v63, %v936_v42  ;;  %v1761_v19 = vsel %vm1754_vm4, %v1757_v50, %v1760_v13 }
 0x121   :  { %v938_v48 = vsel %vm927_vm7, nan, %v937_v30  ;;  %v1762_v2 = vsel %vm927_vm7, nan, %v1761_v19 }
 0x122   :  { %v1892_v11 = vrot.slane %v938_v48, 5  ;;  %v1900_v26 = vrot.slane %v1762_v2, 2  ;;  %v1908_v4 = vrot.slane %v938_v48, 2  ;;  %v1914_v53 = vrot.slane %v1762_v2, 7 }
 0x124   :  { %1896 = vst [vmem:[#allocation5 + $0x68] sm:$0x38] %v1892_v11  ;;  %1904 = vst [vmem:[#allocation5 + $0x78] ss:$-12 sps:$4 sm:$0xc1] %v1900_v26  }
 0x125   :  { %1912 = vst [vmem:[#allocation5 + $0x78] sm:$0xe] %v1908_v4  ;;  %1918 = vst [vmem:[#allocation5 + $0x78] sm:$0x70] %v1914_v53 }
 0x126   :  { %2106 = shalt.err (!%p2103_p9)
}
 0x127   :  { %s2127_s13 = smov 256   ;;  %s2128_s14 = smov 16  }
 0x128   :  { %1930 = dma.vmem_to_hbm [thread:$0]  %s1925_s11, 2048, %s3063_s1, [#allocation4], %s2127_s13, %s2127_s13, %s2128_s14  }
 0x129   :  { %2117 = dma.done.wait [#allocation4], 2048  }
 0x12a   :  { %2118 = vsyncadd [#allocation4], 4294965248 }
 0x12b   :  { %1934 = vsyncpa [#allocation3], 1 }
 0x12c   :  { %1935 = vsyncpa [#allocation4], 1 }

</bundles_post_ra>
